<compile_context>
chip_gen: v7x
topology: tpu7x:2x2x1
jax: 0.10.0
libtpu: 0.0.40
codegen_flags: <defaults>
</compile_context>

<pallas_src>
import math
from functools import partial

import jax
import jax.numpy as jnp
from jax import lax
from jax.experimental import pallas as pl
from jax.experimental.pallas import tpu as pltpu


def _round_up(x, m):
    return ((x + m - 1) // m) * m


def _tap_gru_recurrence_kernel(*refs, use_mask, unroll):
    """One grid step = one (TT, Bs) time-chunk of the recurrence.

    refs (use_mask=True):  mask_ref (SMEM, (T_pad,)), xall_ref (TT,Bs,3Dp),
                           uall_ref (Dp,3Dp), out_ref (TT,Bs,Dp), h_scr (Bs,Dp)
    refs (use_mask=False): same without mask_ref.
    """
    if use_mask:
        mask_ref, xall_ref, uall_ref, out_ref, h_scr = refs
    else:
        mask_ref = None
        xall_ref, uall_ref, out_ref, h_scr = refs

    tc = pl.program_id(1)                  # time-chunk index (sequential axis)
    TT = xall_ref.shape[0]
    Dp = h_scr.shape[-1]

    # init_states = zeros(n_samples, dim) at the start of each batch shard.
    @pl.when(tc == 0)
    def _():
        h_scr[...] = jnp.zeros_like(h_scr)

    # Fused recurrent weight [U_r | U_u | Ux], stationary across the chunk.
    u_all = uall_ref[...]                  # (Dp, 3*Dp)

    def step(i, h):                        # h: (Bs, Dp) f32 carried in vregs
        xa = xall_ref[i].astype(jnp.float32)          # (Bs, 3*Dp)

        # Single MXU matmul per timestep, f32 accumulation.
        hu = jnp.dot(h.astype(uall_ref.dtype), u_all,
                     preferred_element_type=jnp.float32)   # (Bs, 3*Dp)

        # Lane-aligned gate slices (multiples of Dp = round_up(DIM, 128)).
        hu_r, hu_u, hu_x = hu[:, :Dp], hu[:, Dp:2 * Dp], hu[:, 2 * Dp:]
        xa_r, xa_u, xa_x = xa[:, :Dp], xa[:, Dp:2 * Dp], xa[:, 2 * Dp:]

        r = jax.nn.sigmoid(hu_r + xa_r)
        u = jax.nn.sigmoid(hu_u + xa_u)
        h_tilde = jnp.tanh(hu_x * r + xa_x)
        h_new = u * h + (1.0 - u) * h_tilde

        if use_mask:
            # Per-timestep scalar mask:  h = m*h_new + (1-m)*h_prev
            m = mask_ref[tc * TT + i]
            h_new = m * h_new + (1.0 - m) * h

        out_ref[i] = h_new.astype(out_ref.dtype)
        return h_new

    h_scr[...] = lax.fori_loop(0, TT, step, h_scr[...], unroll=unroll)


@partial(jax.jit,
         static_argnames=("time_chunk", "batch_shards", "recurrent_dtype"))
def tap_gru(x, mask, W_T, bW, Wx_T, bWx, U_T, Ux_T, *,
            time_chunk=64, batch_shards=1, recurrent_dtype="bfloat16"):
    """TapGRU forward.

    x:    (T, B, IN) f32           (== PyTorch (nsteps, n_samples, in_dim))
    mask: None, (T,) or (T, 1) f32 (per-timestep; None == all-ones fast path)
    Weights stored transposed as (in_features, out_features);
    biases bW: (2*DIM,), bWx: (DIM,).  Returns (T, B, DIM) f32.
    """
    T, B, IN = x.shape
    DIM = Ux_T.shape[1]
    Dp = _round_up(DIM, 128)               # lane-aligned gate width
    G = 3 * Dp                             # [r | u | x~] packed gate blocks
    io_dtype = jnp.bfloat16 if recurrent_dtype == "bfloat16" else jnp.float32
    io_bytes = jnp.dtype(io_dtype).itemsize

    use_mask = mask is not None
    if use_mask and tuple(mask.shape) not in ((T,), (T, 1)):
        raise NotImplementedError(
            "TapGRU Pallas kernel supports only per-timestep masks of shape "
            f"({T},) or ({T}, 1); got {tuple(mask.shape)}")

    # --- Batch sharding (keep 1 on 1-TC chips; v7x only if Bs stays large) ---
    NS = batch_shards
    B_eff = _round_up(B, 8 * NS)           # each shard sublane (8) aligned
    Bs = B_eff // NS

    # --- Time chunk sized against a generation-safe VMEM budget --------------
    weight_bytes = Dp * G * io_bytes
    single_buffer_w = weight_bytes > (2 << 20)   # only matters when it's big

    def _vmem_bytes(tt):
        return (2 * tt * Bs * G * io_bytes       # streamed projections (2-buf)
                + 2 * tt * Bs * Dp * 4           # f32 output (2-buf)
                + weight_bytes * (1 if single_buffer_w else 2)
                + Bs * Dp * 4)                   # f32 h scratch

    budget = 36 << 20                            # safe on v7x (64 MiB physical)
    TT = max(1, min(time_chunk, T))
    while TT > 1 and _vmem_bytes(TT) > budget:
        TT //= 2
    T_pad = _round_up(T, TT)
    NT = T_pad // TT
    unroll = min(TT, 8)                          # bounded unroll (no vreg blowup)

    def pad_cols(a, to):
        return jnp.pad(a, [(0, 0)] * (a.ndim - 1) + [(0, to - a.shape[-1])])

    # --- Fuse + lane-pad the weights -----------------------------------------
    W_all_T = jnp.concatenate([pad_cols(W_T[:, :DIM], Dp),
                               pad_cols(W_T[:, DIM:2 * DIM], Dp),
                               pad_cols(Wx_T, Dp)], axis=-1)          # (IN, 3*Dp)
    b_all = jnp.concatenate([pad_cols(bW[:DIM], Dp),
                             pad_cols(bW[DIM:2 * DIM], Dp),
                             pad_cols(bWx, Dp)], axis=-1)             # (3*Dp,)
    U_blk = jnp.concatenate([pad_cols(U_T[:, :DIM], Dp),
                             pad_cols(U_T[:, DIM:2 * DIM], Dp),
                             pad_cols(Ux_T, Dp)], axis=-1)            # (DIM, 3*Dp)
    # Zeros in padded rows/cols keep padded lanes harmless.
    U_all = jnp.pad(U_blk, ((0, Dp - DIM), (0, 0))).astype(io_dtype)  # (Dp, 3*Dp)

    # --- Hoisted, time-parallel input projection (one big XLA matmul) --------
    xall = (jnp.einsum('tbi,ig->tbg', x, W_all_T,
                       preferred_element_type=jnp.float32)
            + b_all).astype(io_dtype)                                 # (T, B, 3*Dp)

    # Pad time (extra steps run after the real sequence, sliced off) and batch
    # (sublane alignment). No host-side shard transpose — the BlockSpec
    # index_map picks the (time-chunk, batch-shard) tile directly.
    pad_t, pad_b = T_pad - T, B_eff - B
    if pad_t or pad_b:
        xall = jnp.pad(xall, ((0, pad_t), (0, pad_b), (0, 0)))

    # --- BlockSpecs -----------------------------------------------------------
    x_spec = pl.BlockSpec((TT, Bs, G), lambda s, t: (t, s, 0))
    out_spec = pl.BlockSpec((TT, Bs, Dp), lambda s, t: (t, s, 0))
    if single_buffer_w:
        # Stationary weight: single-buffer it so it does not eat 2x VMEM
        # (critical on v7x's 64 MiB VMEM for large Dp).
        try:
            u_spec = pl.BlockSpec((Dp, G), lambda s, t: (0, 0),
                                  pipeline_mode=pl.Buffered(1))
        except (TypeError, AttributeError):
            u_spec = pl.BlockSpec((Dp, G), lambda s, t: (0, 0))
    else:
        u_spec = pl.BlockSpec((Dp, G), lambda s, t: (0, 0))

    in_specs = [x_spec, u_spec]
    operands = [xall, U_all]
    if use_mask:
        mask1d = mask.reshape(-1).astype(jnp.float32)
        if pad_t:
            mask1d = jnp.pad(mask1d, (0, pad_t))
        in_specs = [pl.BlockSpec(memory_space=pltpu.SMEM)] + in_specs
        operands = [mask1d] + operands

    grid_spec = pltpu.PrefetchScalarGridSpec(
        num_scalar_prefetch=0,
        grid=(NS, NT),
        in_specs=in_specs,
        out_specs=out_spec,
        scratch_shapes=[pltpu.VMEM((Bs, Dp), jnp.float32)],
    )

    vmem_need = _vmem_bytes(TT)
    vmem_limit = int(min(max(int(vmem_need * 1.5) + (4 << 20), 32 << 20),
                         60 << 20))

    out = pl.pallas_call(
        partial(_tap_gru_recurrence_kernel, use_mask=use_mask, unroll=unroll),
        out_shape=jax.ShapeDtypeStruct((T_pad, B_eff, Dp), jnp.float32),
        grid_spec=grid_spec,
        compiler_params=pltpu.CompilerParams(
            dimension_semantics=("parallel", "arbitrary"),  # shards ||, time serial
            vmem_limit_bytes=vmem_limit,
        ),
    )(*operands)

    return out[:T, :B, :DIM]


def tap_gru_ref(x, mask, W_T, bW, Wx_T, bWx, U_T, Ux_T):
    """Pure-JAX f32 reference of the PyTorch forward (for verification)."""
    T, B, _ = x.shape
    dim = Ux_T.shape[1]
    x_ = x @ W_T + bW
    xx_ = x @ Wx_T + bWx
    m = mask.reshape(T, 1, 1).astype(jnp.float32)

    def step(h, inp):
        xw, xwx, mm = inp
        preact = h @ U_T + xw
        r = jax.nn.sigmoid(preact[:, :dim])
        u = jax.nn.sigmoid(preact[:, dim:2 * dim])
        h_tilde = jnp.tanh((h @ Ux_T) * r + xwx)
        h_new = u * h + (1.0 - u) * h_tilde
        h_new = mm * h_new + (1.0 - mm) * h
        return h_new, h_new

    h0 = jnp.zeros((B, dim), jnp.float32)
    _, ys = lax.scan(step, h0, (x_, xx_, m))
    return ys


if __name__ == "__main__":
    # Shapes implied by the module: sequence (nsteps, n_samples, in_dim),
    # hidden size DIM, gates packed as 2*DIM.
    T, B, IN, DIM = 8, 4, 16, 32

    key = jax.random.PRNGKey(0)
    ks = jax.random.split(key, 8)

    def lin_init(k, fan_in, shape):
        # nn.Linear-style uniform(-1/sqrt(fan_in), 1/sqrt(fan_in)) init.
        bound = 1.0 / math.sqrt(fan_in)
        return jax.random.uniform(k, shape, jnp.float32, -bound, bound)

    # Weights stored transposed: (in_features, out_features).
    W_T  = lin_init(ks[0], IN,  (IN, 2 * DIM))    # tap_gru_W
    bW   = lin_init(ks[1], IN,  (2 * DIM,))
    Wx_T = lin_init(ks[2], IN,  (IN, DIM))        # tap_gru_Wx
    bWx  = lin_init(ks[3], IN,  (DIM,))
    U_T  = lin_init(ks[4], DIM, (DIM, 2 * DIM))   # tap_gru_U  (no bias)
    Ux_T = lin_init(ks[5], DIM, (DIM, DIM))       # tap_gru_Ux (no bias)

    x = jax.random.normal(ks[6], (T, B, IN), jnp.float32)

    # 1) Default mask=None path (module default) — all-ones fast path.
    out = tap_gru(x, None, W_T, bW, Wx_T, bWx, U_T, Ux_T)
    jax.block_until_ready(out)
    ref = tap_gru_ref(x, jnp.ones((T, 1), jnp.float32),
                      W_T, bW, Wx_T, bWx, U_T, Ux_T)
    assert out.shape == (T, B, DIM)
    err = float(jnp.max(jnp.abs(out - ref)))
    assert err < 3e-2, err

    # 2) Explicit per-timestep mask path.
    mask = (jax.random.uniform(ks[7], (T, 1)) > 0.3).astype(jnp.float32)
    out_m = tap_gru(x, mask, W_T, bW, Wx_T, bWx, U_T, Ux_T)
    jax.block_until_ready(out_m)
    ref_m = tap_gru_ref(x, mask, W_T, bW, Wx_T, bWx, U_T, Ux_T)
    err_m = float(jnp.max(jnp.abs(out_m - ref_m)))
    assert err_m < 3e-2, err_m

    print("KERNEL_OK")
</pallas_src>

<mosaic_0001>
module attributes {stable_mosaic.version = 11 : i64} {
  func.func @_tap_gru_recurrence_kernel(%arg0: i32, %arg1: i32, %arg2: memref<8x8x384xbf16, #tpu.memory_space<vmem>>, %arg3: memref<128x384xbf16, #tpu.memory_space<vmem>>, %arg4: memref<8x8x128xf32, #tpu.memory_space<vmem>>, %arg5: memref<8x128xf32, #tpu.memory_space<vmem>>) attributes {dimension_semantics = [#tpu.dimension_semantics<parallel>, #tpu.dimension_semantics<arbitrary>], iteration_bounds = array<i64: 1, 1>, scalar_prefetch = 0 : i64, scratch_operands = 1 : i64, tpu.core_type = #tpu.core_type<tc>, window_params = [{transform_indices = @transform_0, window_bounds = array<i64: 8, 8, 384>}, {pipeline_mode = #tpu.pipeline_mode<synchronous>, transform_indices = @transform_1, window_bounds = array<i64: 128, 384>}, {transform_indices = @transform_2, window_bounds = array<i64: 8, 8, 128>}]} {
    %c0_i32 = arith.constant 0 : i32
    %0 = arith.cmpi eq, %arg1, %c0_i32 : i32
    %1 = arith.extui %0 : i1 to i32
    %c0_i32_0 = arith.constant 0 : i32
    %2 = arith.cmpi ne, %1, %c0_i32_0 : i32
    scf.if %2 {
      %cst_70 = arith.constant 0.000000e+00 : f32
      %294 = vector.broadcast %cst_70 : f32 to vector<8x128xf32>
      %c0_71 = arith.constant 0 : index
      %c0_72 = arith.constant 0 : index
      %295 = vector.load %arg5[%c0_71, %c0_72] : memref<8x128xf32, #tpu.memory_space<vmem>>, vector<8x128xf32>
      tpu.vector_store %arg5[%c0_71, %c0_72], %294 {strides = array<i32>} : memref<8x128xf32, #tpu.memory_space<vmem>>, vector<8x128xf32>,
    } else {
    }
    %c0 = arith.constant 0 : index
    %c0_1 = arith.constant 0 : index
    %3 = vector.load %arg3[%c0, %c0_1] : memref<128x384xbf16, #tpu.memory_space<vmem>>, vector<128x384xbf16>
    %c0_2 = arith.constant 0 : index
    %c0_3 = arith.constant 0 : index
    %4 = vector.load %arg5[%c0_2, %c0_3] : memref<8x128xf32, #tpu.memory_space<vmem>>, vector<8x128xf32>
    %c0_i32_4 = arith.constant 0 : i32
    %5 = arith.index_cast %c0_i32_4 : i32 to index
    %c0_5 = arith.constant 0 : index
    %c0_6 = arith.constant 0 : index
    %6 = vector.load %arg2[%5, %c0_5, %c0_6] : memref<8x8x384xbf16, #tpu.memory_space<vmem>>, vector<1x8x384xbf16>
    %7 = vector.shape_cast %6 : vector<1x8x384xbf16> to vector<8x384xbf16>
    %8 = arith.extf %7 : vector<8x384xbf16> to vector<8x384xf32>
    %9 = arith.truncf %4 : vector<8x128xf32> to vector<8x128xbf16>
    %cst = arith.constant dense<0.000000e+00> : vector<8x384xf32>
    %10 = tpu.matmul %9, %3, %cst {dimension_numbers = #tpu.dot_dimension_numbers<[1], [0], [0], [1], [0, 0, 1, 1], [], []>} : vector<8x128xbf16>, vector<128x384xbf16>, vector<8x384xf32> -> vector<8x384xf32>
    %11 = vector.extract_strided_slice %10 {offsets = [0, 0], sizes = [8, 128], strides = [1, 1]} : vector<8x384xf32> to vector<8x128xf32>
    %12 = vector.extract_strided_slice %10 {offsets = [0, 128], sizes = [8, 128], strides = [1, 1]} : vector<8x384xf32> to vector<8x128xf32>
    %13 = vector.extract_strided_slice %10 {offsets = [0, 256], sizes = [8, 128], strides = [1, 1]} : vector<8x384xf32> to vector<8x128xf32>
    %14 = vector.extract_strided_slice %8 {offsets = [0, 0], sizes = [8, 128], strides = [1, 1]} : vector<8x384xf32> to vector<8x128xf32>
    %15 = vector.extract_strided_slice %8 {offsets = [0, 128], sizes = [8, 128], strides = [1, 1]} : vector<8x384xf32> to vector<8x128xf32>
    %16 = vector.extract_strided_slice %8 {offsets = [0, 256], sizes = [8, 128], strides = [1, 1]} : vector<8x384xf32> to vector<8x128xf32>
    %17 = arith.addf %11, %14 : vector<8x128xf32>
    %18 = arith.negf %17 : vector<8x128xf32>
    %19 = math.exp %18 : vector<8x128xf32>
    %cst_7 = arith.constant 1.000000e+00 : f32
    %20 = vector.broadcast %cst_7 : f32 to vector<8x128xf32>
    %21 = arith.addf %20, %19 : vector<8x128xf32>
    %22 = arith.divf %20, %21 : vector<8x128xf32>
    %23 = arith.addf %12, %15 : vector<8x128xf32>
    %24 = arith.negf %23 : vector<8x128xf32>
    %25 = math.exp %24 : vector<8x128xf32>
    %cst_8 = arith.constant 1.000000e+00 : f32
    %26 = vector.broadcast %cst_8 : f32 to vector<8x128xf32>
    %27 = arith.addf %26, %25 : vector<8x128xf32>
    %28 = arith.divf %26, %27 : vector<8x128xf32>
    %29 = arith.mulf %13, %22 : vector<8x128xf32>
    %30 = arith.addf %29, %16 : vector<8x128xf32>
    %31 = math.tanh %30 : vector<8x128xf32>
    %32 = arith.mulf %28, %4 : vector<8x128xf32>
    %cst_9 = arith.constant 1.000000e+00 : f32
    %33 = vector.broadcast %cst_9 : f32 to vector<8x128xf32>
    %34 = arith.subf %33, %28 : vector<8x128xf32>
    %35 = arith.mulf %34, %31 : vector<8x128xf32>
    %36 = arith.addf %32, %35 : vector<8x128xf32>
    %37 = arith.index_cast %c0_i32_4 : i32 to index
    %c0_10 = arith.constant 0 : index
    %c0_11 = arith.constant 0 : index
    %38 = vector.load %arg4[%37, %c0_10, %c0_11] : memref<8x8x128xf32, #tpu.memory_space<vmem>>, vector<1x8x128xf32>
    %39 = vector.shape_cast %38 : vector<1x8x128xf32> to vector<8x128xf32>
    %40 = vector.shape_cast %36 : vector<8x128xf32> to vector<1x8x128xf32>
    tpu.vector_store %arg4[%37, %c0_10, %c0_11], %40 {strides = array<i32>} : memref<8x8x128xf32, #tpu.memory_space<vmem>>, vector<1x8x128xf32>,
    %c1_i32 = arith.constant 1 : i32
    %41 = arith.index_cast %c1_i32 : i32 to index
    %c0_12 = arith.constant 0 : index
    %c0_13 = arith.constant 0 : index
    %42 = vector.load %arg2[%41, %c0_12, %c0_13] : memref<8x8x384xbf16, #tpu.memory_space<vmem>>, vector<1x8x384xbf16>
    %43 = vector.shape_cast %42 : vector<1x8x384xbf16> to vector<8x384xbf16>
    %44 = arith.extf %43 : vector<8x384xbf16> to vector<8x384xf32>
    %45 = arith.truncf %36 : vector<8x128xf32> to vector<8x128xbf16>
    %cst_14 = arith.constant dense<0.000000e+00> : vector<8x384xf32>
    %46 = tpu.matmul %45, %3, %cst_14 {dimension_numbers = #tpu.dot_dimension_numbers<[1], [0], [0], [1], [0, 0, 1, 1], [], []>} : vector<8x128xbf16>, vector<128x384xbf16>, vector<8x384xf32> -> vector<8x384xf32>
    %47 = vector.extract_strided_slice %46 {offsets = [0, 0], sizes = [8, 128], strides = [1, 1]} : vector<8x384xf32> to vector<8x128xf32>
    %48 = vector.extract_strided_slice %46 {offsets = [0, 128], sizes = [8, 128], strides = [1, 1]} : vector<8x384xf32> to vector<8x128xf32>
    %49 = vector.extract_strided_slice %46 {offsets = [0, 256], sizes = [8, 128], strides = [1, 1]} : vector<8x384xf32> to vector<8x128xf32>
    %50 = vector.extract_strided_slice %44 {offsets = [0, 0], sizes = [8, 128], strides = [1, 1]} : vector<8x384xf32> to vector<8x128xf32>
    %51 = vector.extract_strided_slice %44 {offsets = [0, 128], sizes = [8, 128], strides = [1, 1]} : vector<8x384xf32> to vector<8x128xf32>
    %52 = vector.extract_strided_slice %44 {offsets = [0, 256], sizes = [8, 128], strides = [1, 1]} : vector<8x384xf32> to vector<8x128xf32>
    %53 = arith.addf %47, %50 : vector<8x128xf32>
    %54 = arith.negf %53 : vector<8x128xf32>
    %55 = math.exp %54 : vector<8x128xf32>
    %cst_15 = arith.constant 1.000000e+00 : f32
    %56 = vector.broadcast %cst_15 : f32 to vector<8x128xf32>
    %57 = arith.addf %56, %55 : vector<8x128xf32>
    %58 = arith.divf %56, %57 : vector<8x128xf32>
    %59 = arith.addf %48, %51 : vector<8x128xf32>
    %60 = arith.negf %59 : vector<8x128xf32>
    %61 = math.exp %60 : vector<8x128xf32>
    %cst_16 = arith.constant 1.000000e+00 : f32
    %62 = vector.broadcast %cst_16 : f32 to vector<8x128xf32>
    %63 = arith.addf %62, %61 : vector<8x128xf32>
    %64 = arith.divf %62, %63 : vector<8x128xf32>
    %65 = arith.mulf %49, %58 : vector<8x128xf32>
    %66 = arith.addf %65, %52 : vector<8x128xf32>
    %67 = math.tanh %66 : vector<8x128xf32>
    %68 = arith.mulf %64, %36 : vector<8x128xf32>
    %cst_17 = arith.constant 1.000000e+00 : f32
    %69 = vector.broadcast %cst_17 : f32 to vector<8x128xf32>
    %70 = arith.subf %69, %64 : vector<8x128xf32>
    %71 = arith.mulf %70, %67 : vector<8x128xf32>
    %72 = arith.addf %68, %71 : vector<8x128xf32>
    %73 = arith.index_cast %c1_i32 : i32 to index
    %c0_18 = arith.constant 0 : index
    %c0_19 = arith.constant 0 : index
    %74 = vector.load %arg4[%73, %c0_18, %c0_19] : memref<8x8x128xf32, #tpu.memory_space<vmem>>, vector<1x8x128xf32>
    %75 = vector.shape_cast %74 : vector<1x8x128xf32> to vector<8x128xf32>
    %76 = vector.shape_cast %72 : vector<8x128xf32> to vector<1x8x128xf32>
    tpu.vector_store %arg4[%73, %c0_18, %c0_19], %76 {strides = array<i32>} : memref<8x8x128xf32, #tpu.memory_space<vmem>>, vector<1x8x128xf32>,
    %c2_i32 = arith.constant 2 : i32
    %77 = arith.index_cast %c2_i32 : i32 to index
    %c0_20 = arith.constant 0 : index
    %c0_21 = arith.constant 0 : index
    %78 = vector.load %arg2[%77, %c0_20, %c0_21] : memref<8x8x384xbf16, #tpu.memory_space<vmem>>, vector<1x8x384xbf16>
    %79 = vector.shape_cast %78 : vector<1x8x384xbf16> to vector<8x384xbf16>
    %80 = arith.extf %79 : vector<8x384xbf16> to vector<8x384xf32>
    %81 = arith.truncf %72 : vector<8x128xf32> to vector<8x128xbf16>
    %cst_22 = arith.constant dense<0.000000e+00> : vector<8x384xf32>
    %82 = tpu.matmul %81, %3, %cst_22 {dimension_numbers = #tpu.dot_dimension_numbers<[1], [0], [0], [1], [0, 0, 1, 1], [], []>} : vector<8x128xbf16>, vector<128x384xbf16>, vector<8x384xf32> -> vector<8x384xf32>
    %83 = vector.extract_strided_slice %82 {offsets = [0, 0], sizes = [8, 128], strides = [1, 1]} : vector<8x384xf32> to vector<8x128xf32>
    %84 = vector.extract_strided_slice %82 {offsets = [0, 128], sizes = [8, 128], strides = [1, 1]} : vector<8x384xf32> to vector<8x128xf32>
    %85 = vector.extract_strided_slice %82 {offsets = [0, 256], sizes = [8, 128], strides = [1, 1]} : vector<8x384xf32> to vector<8x128xf32>
    %86 = vector.extract_strided_slice %80 {offsets = [0, 0], sizes = [8, 128], strides = [1, 1]} : vector<8x384xf32> to vector<8x128xf32>
    %87 = vector.extract_strided_slice %80 {offsets = [0, 128], sizes = [8, 128], strides = [1, 1]} : vector<8x384xf32> to vector<8x128xf32>
    %88 = vector.extract_strided_slice %80 {offsets = [0, 256], sizes = [8, 128], strides = [1, 1]} : vector<8x384xf32> to vector<8x128xf32>
    %89 = arith.addf %83, %86 : vector<8x128xf32>
    %90 = arith.negf %89 : vector<8x128xf32>
    %91 = math.exp %90 : vector<8x128xf32>
    %cst_23 = arith.constant 1.000000e+00 : f32
    %92 = vector.broadcast %cst_23 : f32 to vector<8x128xf32>
    %93 = arith.addf %92, %91 : vector<8x128xf32>
    %94 = arith.divf %92, %93 : vector<8x128xf32>
    %95 = arith.addf %84, %87 : vector<8x128xf32>
    %96 = arith.negf %95 : vector<8x128xf32>
    %97 = math.exp %96 : vector<8x128xf32>
    %cst_24 = arith.constant 1.000000e+00 : f32
    %98 = vector.broadcast %cst_24 : f32 to vector<8x128xf32>
    %99 = arith.addf %98, %97 : vector<8x128xf32>
    %100 = arith.divf %98, %99 : vector<8x128xf32>
    %101 = arith.mulf %85, %94 : vector<8x128xf32>
    %102 = arith.addf %101, %88 : vector<8x128xf32>
    %103 = math.tanh %102 : vector<8x128xf32>
    %104 = arith.mulf %100, %72 : vector<8x128xf32>
    %cst_25 = arith.constant 1.000000e+00 : f32
    %105 = vector.broadcast %cst_25 : f32 to vector<8x128xf32>
    %106 = arith.subf %105, %100 : vector<8x128xf32>
    %107 = arith.mulf %106, %103 : vector<8x128xf32>
    %108 = arith.addf %104, %107 : vector<8x128xf32>
    %109 = arith.index_cast %c2_i32 : i32 to index
    %c0_26 = arith.constant 0 : index
    %c0_27 = arith.constant 0 : index
    %110 = vector.load %arg4[%109, %c0_26, %c0_27] : memref<8x8x128xf32, #tpu.memory_space<vmem>>, vector<1x8x128xf32>
    %111 = vector.shape_cast %110 : vector<1x8x128xf32> to vector<8x128xf32>
    %112 = vector.shape_cast %108 : vector<8x128xf32> to vector<1x8x128xf32>
    tpu.vector_store %arg4[%109, %c0_26, %c0_27], %112 {strides = array<i32>} : memref<8x8x128xf32, #tpu.memory_space<vmem>>, vector<1x8x128xf32>,
    %c3_i32 = arith.constant 3 : i32
    %113 = arith.index_cast %c3_i32 : i32 to index
    %c0_28 = arith.constant 0 : index
    %c0_29 = arith.constant 0 : index
    %114 = vector.load %arg2[%113, %c0_28, %c0_29] : memref<8x8x384xbf16, #tpu.memory_space<vmem>>, vector<1x8x384xbf16>
    %115 = vector.shape_cast %114 : vector<1x8x384xbf16> to vector<8x384xbf16>
    %116 = arith.extf %115 : vector<8x384xbf16> to vector<8x384xf32>
    %117 = arith.truncf %108 : vector<8x128xf32> to vector<8x128xbf16>
    %cst_30 = arith.constant dense<0.000000e+00> : vector<8x384xf32>
    %118 = tpu.matmul %117, %3, %cst_30 {dimension_numbers = #tpu.dot_dimension_numbers<[1], [0], [0], [1], [0, 0, 1, 1], [], []>} : vector<8x128xbf16>, vector<128x384xbf16>, vector<8x384xf32> -> vector<8x384xf32>
    %119 = vector.extract_strided_slice %118 {offsets = [0, 0], sizes = [8, 128], strides = [1, 1]} : vector<8x384xf32> to vector<8x128xf32>
    %120 = vector.extract_strided_slice %118 {offsets = [0, 128], sizes = [8, 128], strides = [1, 1]} : vector<8x384xf32> to vector<8x128xf32>
    %121 = vector.extract_strided_slice %118 {offsets = [0, 256], sizes = [8, 128], strides = [1, 1]} : vector<8x384xf32> to vector<8x128xf32>
    %122 = vector.extract_strided_slice %116 {offsets = [0, 0], sizes = [8, 128], strides = [1, 1]} : vector<8x384xf32> to vector<8x128xf32>
    %123 = vector.extract_strided_slice %116 {offsets = [0, 128], sizes = [8, 128], strides = [1, 1]} : vector<8x384xf32> to vector<8x128xf32>
    %124 = vector.extract_strided_slice %116 {offsets = [0, 256], sizes = [8, 128], strides = [1, 1]} : vector<8x384xf32> to vector<8x128xf32>
    %125 = arith.addf %119, %122 : vector<8x128xf32>
    %126 = arith.negf %125 : vector<8x128xf32>
    %127 = math.exp %126 : vector<8x128xf32>
    %cst_31 = arith.constant 1.000000e+00 : f32
    %128 = vector.broadcast %cst_31 : f32 to vector<8x128xf32>
    %129 = arith.addf %128, %127 : vector<8x128xf32>
    %130 = arith.divf %128, %129 : vector<8x128xf32>
    %131 = arith.addf %120, %123 : vector<8x128xf32>
    %132 = arith.negf %131 : vector<8x128xf32>
    %133 = math.exp %132 : vector<8x128xf32>
    %cst_32 = arith.constant 1.000000e+00 : f32
    %134 = vector.broadcast %cst_32 : f32 to vector<8x128xf32>
    %135 = arith.addf %134, %133 : vector<8x128xf32>
    %136 = arith.divf %134, %135 : vector<8x128xf32>
    %137 = arith.mulf %121, %130 : vector<8x128xf32>
    %138 = arith.addf %137, %124 : vector<8x128xf32>
    %139 = math.tanh %138 : vector<8x128xf32>
    %140 = arith.mulf %136, %108 : vector<8x128xf32>
    %cst_33 = arith.constant 1.000000e+00 : f32
    %141 = vector.broadcast %cst_33 : f32 to vector<8x128xf32>
    %142 = arith.subf %141, %136 : vector<8x128xf32>
    %143 = arith.mulf %142, %139 : vector<8x128xf32>
    %144 = arith.addf %140, %143 : vector<8x128xf32>
    %145 = arith.index_cast %c3_i32 : i32 to index
    %c0_34 = arith.constant 0 : index
    %c0_35 = arith.constant 0 : index
    %146 = vector.load %arg4[%145, %c0_34, %c0_35] : memref<8x8x128xf32, #tpu.memory_space<vmem>>, vector<1x8x128xf32>
    %147 = vector.shape_cast %146 : vector<1x8x128xf32> to vector<8x128xf32>
    %148 = vector.shape_cast %144 : vector<8x128xf32> to vector<1x8x128xf32>
    tpu.vector_store %arg4[%145, %c0_34, %c0_35], %148 {strides = array<i32>} : memref<8x8x128xf32, #tpu.memory_space<vmem>>, vector<1x8x128xf32>,
    %c4_i32 = arith.constant 4 : i32
    %149 = arith.index_cast %c4_i32 : i32 to index
    %c0_36 = arith.constant 0 : index
    %c0_37 = arith.constant 0 : index
    %150 = vector.load %arg2[%149, %c0_36, %c0_37] : memref<8x8x384xbf16, #tpu.memory_space<vmem>>, vector<1x8x384xbf16>
    %151 = vector.shape_cast %150 : vector<1x8x384xbf16> to vector<8x384xbf16>
    %152 = arith.extf %151 : vector<8x384xbf16> to vector<8x384xf32>
    %153 = arith.truncf %144 : vector<8x128xf32> to vector<8x128xbf16>
    %cst_38 = arith.constant dense<0.000000e+00> : vector<8x384xf32>
    %154 = tpu.matmul %153, %3, %cst_38 {dimension_numbers = #tpu.dot_dimension_numbers<[1], [0], [0], [1], [0, 0, 1, 1], [], []>} : vector<8x128xbf16>, vector<128x384xbf16>, vector<8x384xf32> -> vector<8x384xf32>
    %155 = vector.extract_strided_slice %154 {offsets = [0, 0], sizes = [8, 128], strides = [1, 1]} : vector<8x384xf32> to vector<8x128xf32>
    %156 = vector.extract_strided_slice %154 {offsets = [0, 128], sizes = [8, 128], strides = [1, 1]} : vector<8x384xf32> to vector<8x128xf32>
    %157 = vector.extract_strided_slice %154 {offsets = [0, 256], sizes = [8, 128], strides = [1, 1]} : vector<8x384xf32> to vector<8x128xf32>
    %158 = vector.extract_strided_slice %152 {offsets = [0, 0], sizes = [8, 128], strides = [1, 1]} : vector<8x384xf32> to vector<8x128xf32>
    %159 = vector.extract_strided_slice %152 {offsets = [0, 128], sizes = [8, 128], strides = [1, 1]} : vector<8x384xf32> to vector<8x128xf32>
    %160 = vector.extract_strided_slice %152 {offsets = [0, 256], sizes = [8, 128], strides = [1, 1]} : vector<8x384xf32> to vector<8x128xf32>
    %161 = arith.addf %155, %158 : vector<8x128xf32>
    %162 = arith.negf %161 : vector<8x128xf32>
    %163 = math.exp %162 : vector<8x128xf32>
    %cst_39 = arith.constant 1.000000e+00 : f32
    %164 = vector.broadcast %cst_39 : f32 to vector<8x128xf32>
    %165 = arith.addf %164, %163 : vector<8x128xf32>
    %166 = arith.divf %164, %165 : vector<8x128xf32>
    %167 = arith.addf %156, %159 : vector<8x128xf32>
    %168 = arith.negf %167 : vector<8x128xf32>
    %169 = math.exp %168 : vector<8x128xf32>
    %cst_40 = arith.constant 1.000000e+00 : f32
    %170 = vector.broadcast %cst_40 : f32 to vector<8x128xf32>
    %171 = arith.addf %170, %169 : vector<8x128xf32>
    %172 = arith.divf %170, %171 : vector<8x128xf32>
    %173 = arith.mulf %157, %166 : vector<8x128xf32>
    %174 = arith.addf %173, %160 : vector<8x128xf32>
    %175 = math.tanh %174 : vector<8x128xf32>
    %176 = arith.mulf %172, %144 : vector<8x128xf32>
    %cst_41 = arith.constant 1.000000e+00 : f32
    %177 = vector.broadcast %cst_41 : f32 to vector<8x128xf32>
    %178 = arith.subf %177, %172 : vector<8x128xf32>
    %179 = arith.mulf %178, %175 : vector<8x128xf32>
    %180 = arith.addf %176, %179 : vector<8x128xf32>
    %181 = arith.index_cast %c4_i32 : i32 to index
    %c0_42 = arith.constant 0 : index
    %c0_43 = arith.constant 0 : index
    %182 = vector.load %arg4[%181, %c0_42, %c0_43] : memref<8x8x128xf32, #tpu.memory_space<vmem>>, vector<1x8x128xf32>
    %183 = vector.shape_cast %182 : vector<1x8x128xf32> to vector<8x128xf32>
    %184 = vector.shape_cast %180 : vector<8x128xf32> to vector<1x8x128xf32>
    tpu.vector_store %arg4[%181, %c0_42, %c0_43], %184 {strides = array<i32>} : memref<8x8x128xf32, #tpu.memory_space<vmem>>, vector<1x8x128xf32>,
    %c5_i32 = arith.constant 5 : i32
    %185 = arith.index_cast %c5_i32 : i32 to index
    %c0_44 = arith.constant 0 : index
    %c0_45 = arith.constant 0 : index
    %186 = vector.load %arg2[%185, %c0_44, %c0_45] : memref<8x8x384xbf16, #tpu.memory_space<vmem>>, vector<1x8x384xbf16>
    %187 = vector.shape_cast %186 : vector<1x8x384xbf16> to vector<8x384xbf16>
    %188 = arith.extf %187 : vector<8x384xbf16> to vector<8x384xf32>
    %189 = arith.truncf %180 : vector<8x128xf32> to vector<8x128xbf16>
    %cst_46 = arith.constant dense<0.000000e+00> : vector<8x384xf32>
    %190 = tpu.matmul %189, %3, %cst_46 {dimension_numbers = #tpu.dot_dimension_numbers<[1], [0], [0], [1], [0, 0, 1, 1], [], []>} : vector<8x128xbf16>, vector<128x384xbf16>, vector<8x384xf32> -> vector<8x384xf32>
    %191 = vector.extract_strided_slice %190 {offsets = [0, 0], sizes = [8, 128], strides = [1, 1]} : vector<8x384xf32> to vector<8x128xf32>
    %192 = vector.extract_strided_slice %190 {offsets = [0, 128], sizes = [8, 128], strides = [1, 1]} : vector<8x384xf32> to vector<8x128xf32>
    %193 = vector.extract_strided_slice %190 {offsets = [0, 256], sizes = [8, 128], strides = [1, 1]} : vector<8x384xf32> to vector<8x128xf32>
    %194 = vector.extract_strided_slice %188 {offsets = [0, 0], sizes = [8, 128], strides = [1, 1]} : vector<8x384xf32> to vector<8x128xf32>
    %195 = vector.extract_strided_slice %188 {offsets = [0, 128], sizes = [8, 128], strides = [1, 1]} : vector<8x384xf32> to vector<8x128xf32>
    %196 = vector.extract_strided_slice %188 {offsets = [0, 256], sizes = [8, 128], strides = [1, 1]} : vector<8x384xf32> to vector<8x128xf32>
    %197 = arith.addf %191, %194 : vector<8x128xf32>
    %198 = arith.negf %197 : vector<8x128xf32>
    %199 = math.exp %198 : vector<8x128xf32>
    %cst_47 = arith.constant 1.000000e+00 : f32
    %200 = vector.broadcast %cst_47 : f32 to vector<8x128xf32>
    %201 = arith.addf %200, %199 : vector<8x128xf32>
    %202 = arith.divf %200, %201 : vector<8x128xf32>
    %203 = arith.addf %192, %195 : vector<8x128xf32>
    %204 = arith.negf %203 : vector<8x128xf32>
    %205 = math.exp %204 : vector<8x128xf32>
    %cst_48 = arith.constant 1.000000e+00 : f32
    %206 = vector.broadcast %cst_48 : f32 to vector<8x128xf32>
    %207 = arith.addf %206, %205 : vector<8x128xf32>
    %208 = arith.divf %206, %207 : vector<8x128xf32>
    %209 = arith.mulf %193, %202 : vector<8x128xf32>
    %210 = arith.addf %209, %196 : vector<8x128xf32>
    %211 = math.tanh %210 : vector<8x128xf32>
    %212 = arith.mulf %208, %180 : vector<8x128xf32>
    %cst_49 = arith.constant 1.000000e+00 : f32
    %213 = vector.broadcast %cst_49 : f32 to vector<8x128xf32>
    %214 = arith.subf %213, %208 : vector<8x128xf32>
    %215 = arith.mulf %214, %211 : vector<8x128xf32>
    %216 = arith.addf %212, %215 : vector<8x128xf32>
    %217 = arith.index_cast %c5_i32 : i32 to index
    %c0_50 = arith.constant 0 : index
    %c0_51 = arith.constant 0 : index
    %218 = vector.load %arg4[%217, %c0_50, %c0_51] : memref<8x8x128xf32, #tpu.memory_space<vmem>>, vector<1x8x128xf32>
    %219 = vector.shape_cast %218 : vector<1x8x128xf32> to vector<8x128xf32>
    %220 = vector.shape_cast %216 : vector<8x128xf32> to vector<1x8x128xf32>
    tpu.vector_store %arg4[%217, %c0_50, %c0_51], %220 {strides = array<i32>} : memref<8x8x128xf32, #tpu.memory_space<vmem>>, vector<1x8x128xf32>,
    %c6_i32 = arith.constant 6 : i32
    %221 = arith.index_cast %c6_i32 : i32 to index
    %c0_52 = arith.constant 0 : index
    %c0_53 = arith.constant 0 : index
    %222 = vector.load %arg2[%221, %c0_52, %c0_53] : memref<8x8x384xbf16, #tpu.memory_space<vmem>>, vector<1x8x384xbf16>
    %223 = vector.shape_cast %222 : vector<1x8x384xbf16> to vector<8x384xbf16>
    %224 = arith.extf %223 : vector<8x384xbf16> to vector<8x384xf32>
    %225 = arith.truncf %216 : vector<8x128xf32> to vector<8x128xbf16>
    %cst_54 = arith.constant dense<0.000000e+00> : vector<8x384xf32>
    %226 = tpu.matmul %225, %3, %cst_54 {dimension_numbers = #tpu.dot_dimension_numbers<[1], [0], [0], [1], [0, 0, 1, 1], [], []>} : vector<8x128xbf16>, vector<128x384xbf16>, vector<8x384xf32> -> vector<8x384xf32>
    %227 = vector.extract_strided_slice %226 {offsets = [0, 0], sizes = [8, 128], strides = [1, 1]} : vector<8x384xf32> to vector<8x128xf32>
    %228 = vector.extract_strided_slice %226 {offsets = [0, 128], sizes = [8, 128], strides = [1, 1]} : vector<8x384xf32> to vector<8x128xf32>
    %229 = vector.extract_strided_slice %226 {offsets = [0, 256], sizes = [8, 128], strides = [1, 1]} : vector<8x384xf32> to vector<8x128xf32>
    %230 = vector.extract_strided_slice %224 {offsets = [0, 0], sizes = [8, 128], strides = [1, 1]} : vector<8x384xf32> to vector<8x128xf32>
    %231 = vector.extract_strided_slice %224 {offsets = [0, 128], sizes = [8, 128], strides = [1, 1]} : vector<8x384xf32> to vector<8x128xf32>
    %232 = vector.extract_strided_slice %224 {offsets = [0, 256], sizes = [8, 128], strides = [1, 1]} : vector<8x384xf32> to vector<8x128xf32>
    %233 = arith.addf %227, %230 : vector<8x128xf32>
    %234 = arith.negf %233 : vector<8x128xf32>
    %235 = math.exp %234 : vector<8x128xf32>
    %cst_55 = arith.constant 1.000000e+00 : f32
    %236 = vector.broadcast %cst_55 : f32 to vector<8x128xf32>
    %237 = arith.addf %236, %235 : vector<8x128xf32>
    %238 = arith.divf %236, %237 : vector<8x128xf32>
    %239 = arith.addf %228, %231 : vector<8x128xf32>
    %240 = arith.negf %239 : vector<8x128xf32>
    %241 = math.exp %240 : vector<8x128xf32>
    %cst_56 = arith.constant 1.000000e+00 : f32
    %242 = vector.broadcast %cst_56 : f32 to vector<8x128xf32>
    %243 = arith.addf %242, %241 : vector<8x128xf32>
    %244 = arith.divf %242, %243 : vector<8x128xf32>
    %245 = arith.mulf %229, %238 : vector<8x128xf32>
    %246 = arith.addf %245, %232 : vector<8x128xf32>
    %247 = math.tanh %246 : vector<8x128xf32>
    %248 = arith.mulf %244, %216 : vector<8x128xf32>
    %cst_57 = arith.constant 1.000000e+00 : f32
    %249 = vector.broadcast %cst_57 : f32 to vector<8x128xf32>
    %250 = arith.subf %249, %244 : vector<8x128xf32>
    %251 = arith.mulf %250, %247 : vector<8x128xf32>
    %252 = arith.addf %248, %251 : vector<8x128xf32>
    %253 = arith.index_cast %c6_i32 : i32 to index
    %c0_58 = arith.constant 0 : index
    %c0_59 = arith.constant 0 : index
    %254 = vector.load %arg4[%253, %c0_58, %c0_59] : memref<8x8x128xf32, #tpu.memory_space<vmem>>, vector<1x8x128xf32>
    %255 = vector.shape_cast %254 : vector<1x8x128xf32> to vector<8x128xf32>
    %256 = vector.shape_cast %252 : vector<8x128xf32> to vector<1x8x128xf32>
    tpu.vector_store %arg4[%253, %c0_58, %c0_59], %256 {strides = array<i32>} : memref<8x8x128xf32, #tpu.memory_space<vmem>>, vector<1x8x128xf32>,
    %c7_i32 = arith.constant 7 : i32
    %257 = arith.index_cast %c7_i32 : i32 to index
    %c0_60 = arith.constant 0 : index
    %c0_61 = arith.constant 0 : index
    %258 = vector.load %arg2[%257, %c0_60, %c0_61] : memref<8x8x384xbf16, #tpu.memory_space<vmem>>, vector<1x8x384xbf16>
    %259 = vector.shape_cast %258 : vector<1x8x384xbf16> to vector<8x384xbf16>
    %260 = arith.extf %259 : vector<8x384xbf16> to vector<8x384xf32>
    %261 = arith.truncf %252 : vector<8x128xf32> to vector<8x128xbf16>
    %cst_62 = arith.constant dense<0.000000e+00> : vector<8x384xf32>
    %262 = tpu.matmul %261, %3, %cst_62 {dimension_numbers = #tpu.dot_dimension_numbers<[1], [0], [0], [1], [0, 0, 1, 1], [], []>} : vector<8x128xbf16>, vector<128x384xbf16>, vector<8x384xf32> -> vector<8x384xf32>
    %263 = vector.extract_strided_slice %262 {offsets = [0, 0], sizes = [8, 128], strides = [1, 1]} : vector<8x384xf32> to vector<8x128xf32>
    %264 = vector.extract_strided_slice %262 {offsets = [0, 128], sizes = [8, 128], strides = [1, 1]} : vector<8x384xf32> to vector<8x128xf32>
    %265 = vector.extract_strided_slice %262 {offsets = [0, 256], sizes = [8, 128], strides = [1, 1]} : vector<8x384xf32> to vector<8x128xf32>
    %266 = vector.extract_strided_slice %260 {offsets = [0, 0], sizes = [8, 128], strides = [1, 1]} : vector<8x384xf32> to vector<8x128xf32>
    %267 = vector.extract_strided_slice %260 {offsets = [0, 128], sizes = [8, 128], strides = [1, 1]} : vector<8x384xf32> to vector<8x128xf32>
    %268 = vector.extract_strided_slice %260 {offsets = [0, 256], sizes = [8, 128], strides = [1, 1]} : vector<8x384xf32> to vector<8x128xf32>
    %269 = arith.addf %263, %266 : vector<8x128xf32>
    %270 = arith.negf %269 : vector<8x128xf32>
    %271 = math.exp %270 : vector<8x128xf32>
    %cst_63 = arith.constant 1.000000e+00 : f32
    %272 = vector.broadcast %cst_63 : f32 to vector<8x128xf32>
    %273 = arith.addf %272, %271 : vector<8x128xf32>
    %274 = arith.divf %272, %273 : vector<8x128xf32>
    %275 = arith.addf %264, %267 : vector<8x128xf32>
    %276 = arith.negf %275 : vector<8x128xf32>
    %277 = math.exp %276 : vector<8x128xf32>
    %cst_64 = arith.constant 1.000000e+00 : f32
    %278 = vector.broadcast %cst_64 : f32 to vector<8x128xf32>
    %279 = arith.addf %278, %277 : vector<8x128xf32>
    %280 = arith.divf %278, %279 : vector<8x128xf32>
    %281 = arith.mulf %265, %274 : vector<8x128xf32>
    %282 = arith.addf %281, %268 : vector<8x128xf32>
    %283 = math.tanh %282 : vector<8x128xf32>
    %284 = arith.mulf %280, %252 : vector<8x128xf32>
    %cst_65 = arith.constant 1.000000e+00 : f32
    %285 = vector.broadcast %cst_65 : f32 to vector<8x128xf32>
    %286 = arith.subf %285, %280 : vector<8x128xf32>
    %287 = arith.mulf %286, %283 : vector<8x128xf32>
    %288 = arith.addf %284, %287 : vector<8x128xf32>
    %289 = arith.index_cast %c7_i32 : i32 to index
    %c0_66 = arith.constant 0 : index
    %c0_67 = arith.constant 0 : index
    %290 = vector.load %arg4[%289, %c0_66, %c0_67] : memref<8x8x128xf32, #tpu.memory_space<vmem>>, vector<1x8x128xf32>
    %291 = vector.shape_cast %290 : vector<1x8x128xf32> to vector<8x128xf32>
    %292 = vector.shape_cast %288 : vector<8x128xf32> to vector<1x8x128xf32>
    tpu.vector_store %arg4[%289, %c0_66, %c0_67], %292 {strides = array<i32>} : memref<8x8x128xf32, #tpu.memory_space<vmem>>, vector<1x8x128xf32>,
    %c8_i32 = arith.constant 8 : i32
    %c0_68 = arith.constant 0 : index
    %c0_69 = arith.constant 0 : index
    %293 = vector.load %arg5[%c0_68, %c0_69] : memref<8x128xf32, #tpu.memory_space<vmem>>, vector<8x128xf32>
    tpu.vector_store %arg5[%c0_68, %c0_69], %288 {strides = array<i32>} : memref<8x128xf32, #tpu.memory_space<vmem>>, vector<8x128xf32>,
    return
  }
  func.func @transform_0(%arg0: i32, %arg1: i32) -> (i32, i32, i32) {
    %c0_i32 = arith.constant 0 : i32
    %c0_i32_0 = arith.constant 0 : i32
    return %arg1, %arg0, %c0_i32 : i32, i32, i32
  }
  func.func @transform_1(%arg0: i32, %arg1: i32) -> (i32, i32) {
    %c0_i32 = arith.constant 0 : i32
    %c0_i32_0 = arith.constant 0 : i32
    %c0_i32_1 = arith.constant 0 : i32
    return %c0_i32, %c0_i32_0 : i32, i32
  }
  func.func @transform_2(%arg0: i32, %arg1: i32) -> (i32, i32, i32) {
    %c0_i32 = arith.constant 0 : i32
    %c0_i32_0 = arith.constant 0 : i32
    return %arg1, %arg0, %c0_i32 : i32, i32, i32
  }
}

</mosaic_0001>

<bundles_post_ra>
// kernel: tap_gru.1
= control target key start
LH: loop header
LB: loop body
LE: loop exit
PB: predicated region body
PF: predicated region fallthrough
CT: control target
= control target key end

     0   :  { %v1486_v1 = vmov 0.0   ;;  %v1487_v2 = vmov 0   ;;  %vm1488_vm0 = vmmov 0   ;;  %v1489_v25 = vmov 0.0|0.0   ;;  %s2032_s1 = inlined_call_operand.vmem [shape: bf16[128,384], index: 1, kind: input, shape index: {}]   ;;  %s2033_s0 = inlined_call_operand.vmem [shape: bf16[8,8,384], index: 0, kind: input, shape index: {}]   ;;  %s2034_s2 = inlined_call_operand.vmem [shape: f32[8,8,128], index: 2, kind: output, shape index: {}]  }
   0x1   :  { %v1508_v0 = vld [vmem:[%s2032_s1 + $0x4] ss:$12 sps:$4 sm:$0xff]   ;;  %1202 = vmatprep.subr.bf16.mxu1 %v1486_v1  ;;  %216 = vmatprep.mubr.bf16.mxu0 %v1487_v2  ;;  %v1515_v3 = vld [vmem:[%s2032_s1] ss:$12 sps:$4 sm:$0xff]   ;;  %v1523_v4 = vld [vmem:[%s2032_s1 + $0x1c] ss:$12 sps:$4 sm:$0xff]  }
   0x2   :  { %1218 = vmatprep.mubr.msk.bf16.mxu1 %vm1488_vm0, %v1486_v1  ;;  %184 = vmatprep.subr.bf16.mxu0 %v1508_v0  ;;  %v1529_v5 = vld [vmem:[%s2032_s1 + $0x18] ss:$12 sps:$4 sm:$0xff]   ;;  %v1535_v6 = vld [vmem:[%s2032_s1 + $0x34] ss:$12 sps:$4 sm:$0xff]   ;;  %v1541_v7 = vld [vmem:[%s2032_s1 + $0x30] ss:$12 sps:$4 sm:$0xff]  }
   0x3   :  { %185 = vmatpush1.bf16.msra.mxu0 %v1515_v3  ;;  %v1547_v8 = vld [vmem:[%s2032_s1 + $0x4c] ss:$12 sps:$4 sm:$0xff]   ;;  %v1552_v9 = vld [vmem:[%s2032_s1 + $0x8] ss:$12 sps:$4 sm:$0xff]   ;;  %v1563_v11 = vld [vmem:[%s2032_s1 + $0x64] ss:$12 sps:$4 sm:$0xff]  }
   0x4   :  { %186 = vmatprep.subr.bf16.mxu0 %v1523_v4  ;;  %v1558_v10 = vld [vmem:[%s2032_s1 + $0x48] ss:$12 sps:$4 sm:$0xff]   ;;  %1203 = vmatpush3.bf16.msra.mxu1 %v1552_v9  ;;  %v1570_v12 = vld [vmem:[%s2032_s1 + $0x20] ss:$12 sps:$4 sm:$0xff]   ;;  %v1589_v15 = vld [vmem:[%s2032_s1 + $0x38] ss:$12 sps:$4 sm:$0xff]  }
   0x5   :  { %1204 = vmatprep.subr.bf16.mxu1 %v1486_v1  ;;  %v1576_v13 = vld [vmem:[%s2032_s1 + $0x60] ss:$12 sps:$4 sm:$0xff]   ;;  %v1582_v14 = vld [vmem:[%s2032_s1 + $0x7c] ss:$12 sps:$4 sm:$0xff]   ;;  %v1596_v16 = vld [vmem:[%s2032_s1 + $0x78] ss:$12 sps:$4 sm:$0xff]  }
   0x6   :  { %v1602_v17 = vld [vmem:[%s2032_s1 + $0x94] ss:$12 sps:$4 sm:$0xff]   ;;  %v1608_v18 = vld [vmem:[%s2032_s1 + $0x50] ss:$12 sps:$4 sm:$0xff]   ;;  %v1621_v20 = vld [vmem:[%s2032_s1 + $0xac] ss:$12 sps:$4 sm:$0xff]  }
   0x7   :  { %187 = vmatpush1.bf16.msra.mxu0 %v1529_v5  ;;  %v1615_v19 = vld [vmem:[%s2032_s1 + $0x90] ss:$12 sps:$4 sm:$0xff]   ;;  %v1627_v21 = vld [vmem:[%s2032_s1 + $0x68] ss:$12 sps:$4 sm:$0xff]   ;;  %v1641_v23 = vld [vmem:[%s2032_s1 + $0x80] ss:$12 sps:$4 sm:$0xff]  }
   0x8   :  { %188 = vmatprep.subr.bf16.mxu0 %v1535_v6  ;;  %1205 = vmatpush3.bf16.msra.mxu1 %v1570_v12  ;;  %v1634_v22 = vld [vmem:[%s2032_s1 + $0xa8] ss:$12 sps:$4 sm:$0xff]   ;;  %v1649_v24 = vld [vmem:[%s2032_s1 + $0x98] ss:$12 sps:$4 sm:$0xff]   ;;  %v1659_v26 = vld [vmem:[%s2032_s1 + $0xb0] ss:$12 sps:$4 sm:$0xff]  }
   0x9   :  { %1206 = vmatprep.subr.bf16.mxu1 %v1486_v1  ;;  %v50_v27 = vld [vmem:[%s2033_s0] sm:$0xff]  ;;  %v51_v45 = vld [vmem:[%s2033_s0 + $0x8] sm:$0xf]  ;;  %v1095_v58 = vld [vmem:[%s2033_s0 + $0xc] sm:$0xff] }
   0xa   :  { %v52_v28 = vunpack.c.l.bf16 %v50_v27  ;;  %v53_v30 = vunpack.c.h.bf16 %v50_v27  ;;  %v54_v47 = vunpack.c.l.bf16 %v51_v45  ;;  %v290_v59 = vunpack.c.l.bf16 %v1095_v58 }
   0xb   :  { %189 = vmatpush1.bf16.msra.mxu0 %v1541_v7  ;;  %v291_v62 = vunpack.c.h.bf16 %v1095_v58 }
   0xc   :  { %190 = vmatprep.subr.bf16.mxu0 %v1547_v8  ;;  %1207 = vmatpush3.bf16.msra.mxu1 %v1589_v15 }
   0xd   :  { %1208 = vmatprep.subr.bf16.mxu1 %v1486_v1 }
   0xf   :  { %191 = vmatpush1.bf16.msra.mxu0 %v1558_v10 }
  0x10   :  { %192 = vmatprep.subr.bf16.mxu0 %v1563_v11  ;;  %1209 = vmatpush3.bf16.msra.mxu1 %v1608_v18 }
  0x11   :  { %1210 = vmatprep.subr.bf16.mxu1 %v1486_v1 }
  0x13   :  { %193 = vmatpush1.bf16.msra.mxu0 %v1576_v13 }
  0x14   :  { %194 = vmatprep.subr.bf16.mxu0 %v1582_v14  ;;  %1211 = vmatpush3.bf16.msra.mxu1 %v1627_v21 }
  0x15   :  { %1212 = vmatprep.subr.bf16.mxu1 %v1486_v1 }
  0x17   :  { %195 = vmatpush1.bf16.msra.mxu0 %v1596_v16 }
  0x18   :  { %196 = vmatprep.subr.bf16.mxu0 %v1602_v17  ;;  %1213 = vmatpush3.bf16.msra.mxu1 %v1641_v23 }
  0x19   :  { %1214 = vmatprep.subr.bf16.mxu1 %v1486_v1 }
  0x1b   :  { %197 = vmatpush1.bf16.msra.mxu0 %v1615_v19 }
  0x1c   :  { %198 = vmatprep.subr.bf16.mxu0 %v1621_v20  ;;  %1215 = vmatpush3.bf16.msra.mxu1 %v1649_v24 }
  0x1d   :  { %1216 = vmatprep.subr.bf16.mxu1 %v1486_v1 }
  0x1f   :  { %199 = vmatpush1.bf16.msra.mxu0 %v1634_v22 }
  0x20   :  { %294 = vmatprep.subr.bf16.mxu0 %v1508_v0  ;;  %1217 = vmatpush3.bf16.msra.mxu1 %v1659_v26 }
  0x21   :  { %1222 = vmatprep.subr.bf16.mxu1 %v1486_v1 }
  0x22   :  { %217 = vmatmul.mubr.bf16.vlgmr.msra.gmra.mrb[0].mxu0 %v1489_v25 }
  0x23   :  { %295 = vmatpush1.bf16.msra.mxu0 %v1515_v3  ;;  %326 = vmatprep.mubr.bf16.mxu0 %v1487_v2 }
  0x24   :  { %296 = vmatprep.subr.bf16.mxu0 %v1523_v4  ;;  %1219 = vmatmul.mubr.bf16.vlgmr.msra.gmra.mrb[0].mxu1 %v1489_v25 }
  0x25   :  { %1223 = vmatpush3.bf16.msra.mxu1 %v1552_v9  ;;  %1238 = vmatprep.mubr.msk.bf16.mxu1 %vm1488_vm0, %v1486_v1 }
  0x26   :  { %1224 = vmatprep.subr.bf16.mxu1 %v1486_v1 }
  0x27   :  { %297 = vmatpush1.bf16.msra.mxu0 %v1529_v5 }
  0x28   :  { %298 = vmatprep.subr.bf16.mxu0 %v1535_v6 }
  0x29   :  { %1225 = vmatpush3.bf16.msra.mxu1 %v1570_v12 }
  0x2a   :  { %1226 = vmatprep.subr.bf16.mxu1 %v1486_v1 }
  0x2b   :  { %299 = vmatpush1.bf16.msra.mxu0 %v1541_v7 }
  0x2c   :  { %300 = vmatprep.subr.bf16.mxu0 %v1547_v8 }
  0x2d   :  { %1227 = vmatpush3.bf16.msra.mxu1 %v1589_v15 }
  0x2e   :  { %1228 = vmatprep.subr.bf16.mxu1 %v1486_v1 }
  0x2f   :  { %301 = vmatpush1.bf16.msra.mxu0 %v1558_v10 }
  0x30   :  { %302 = vmatprep.subr.bf16.mxu0 %v1563_v11 }
  0x31   :  { %1229 = vmatpush3.bf16.msra.mxu1 %v1608_v18 }
  0x32   :  { %1230 = vmatprep.subr.bf16.mxu1 %v1486_v1 }
  0x33   :  { %303 = vmatpush1.bf16.msra.mxu0 %v1576_v13 }
  0x34   :  { %304 = vmatprep.subr.bf16.mxu0 %v1582_v14 }
  0x35   :  { %1231 = vmatpush3.bf16.msra.mxu1 %v1627_v21 }
  0x36   :  { %1232 = vmatprep.subr.bf16.mxu1 %v1486_v1 }
  0x37   :  { %305 = vmatpush1.bf16.msra.mxu0 %v1596_v16 }
  0x38   :  { %306 = vmatprep.subr.bf16.mxu0 %v1602_v17 }
  0x39   :  { %1233 = vmatpush3.bf16.msra.mxu1 %v1641_v23 }
  0x3a   :  { %1234 = vmatprep.subr.bf16.mxu1 %v1486_v1 }
  0x3b   :  { %307 = vmatpush1.bf16.msra.mxu0 %v1615_v19 }
  0x3c   :  { %308 = vmatprep.subr.bf16.mxu0 %v1621_v20 }
  0x3d   :  { %1235 = vmatpush3.bf16.msra.mxu1 %v1649_v24 }
  0x3e   :  { %1236 = vmatprep.subr.bf16.mxu1 %v1486_v1 }
  0x3f   :  { %309 = vmatpush1.bf16.msra.mxu0 %v1634_v22 }
  0x40   :  { %405 = vmatprep.subr.bf16.mxu0 %v1508_v0 }
  0x41   :  { %1237 = vmatpush3.bf16.msra.mxu1 %v1659_v26 }
  0x42   :  { %1242 = vmatprep.subr.bf16.mxu1 %v1486_v1 }
  0xf5   :  { %v218_v29 = vpop.f32.mrb[0].mxu0 }
  0xf6   :  { %v265_v31 = vadd.f32 %v218_v29, %v52_v28  ;;  %v220_v32 = vpop.f32.mrb[1].mxu0 }
  0xf7   :  { %v222_v33 = vpop.f32.mrb[2].mxu0  ;;  %v272_v36 = vadd.f32 %v220_v32, %v53_v30  ;;  %v259_v38 = vpop.f32.mrb[0].mxu1 }
  0xf8   :  { %v1093_v34 = vmul.f32 -1.442695, %v265_v31  ;;  %v223_v35 = vpop.f32.mrb[3].mxu0  ;;  %v1220_v39 = vpop.f32.mrb[1].mxu1 }
  0xf9   :  { %v1094_v37 = vmul.f32 -1.442695, %v272_v36  ;;  %v262_v40 = vpop.f32.mrb[2].mxu1 }
  0xfa   :  { %1398 = vpow2.f32 %v1093_v34  ;;  %v1221_v41 = vpop.f32.mrb[3].mxu1 }
  0xfb   :  { %1400 = vpow2.f32 %v1094_v37 }
 0x104   :  { %v1399_v42 = vpop.eup %1398 }
 0x105   :  { %v269_v43 = vadd.f32 1.0, %v1399_v42  ;;  %v1401_v44 = vpop.eup %1400 }
 0x106   :  { %v276_v46 = vadd.f32 1.0, %v1401_v44 }
 0x107   :  { %1402 = vrcp.f32 %v269_v43 }
 0x108   :  { %1404 = vrcp.f32 %v276_v46 }
 0x111   :  { %v1403_v48 = vpop.eup %1402 }
 0x112   :  { %v279_v49 = vmul.f32 %v1403_v48, %v259_v38  ;;  %v1405_v51 = vpop.eup %1404  ;;  %v1752_v38 = vld [vmem:[%s2033_s0 + $0x14] ss:$12 sps:$4 sm:$0xff]  }
 0x113   :  { %v283_v52 = vsub.f32 1.0, %v1405_v51  ;;  %v282_v54 = vmul.f32 0.0, %v1405_v51  ;;  %v292_v40 = vunpack.c.l.bf16 %v1752_v38  ;;  %v1100_v51 = vld [vmem:[%s2033_s0 + $0x18] sm:$0xff] }
 0x114   :  { %v280_v50 = vadd.f32 %v279_v49, %v54_v47 }
 0x116   :  { %1406 = vtanh.f32 %v280_v50 }
 0x120   :  { %v1407_v53 = vpop.eup %1406 }
 0x121   :  { %v284_v55 = vmul.f32 %v1407_v53, %v283_v52  ;;  %v401_v52 = vunpack.c.l.bf16 %v1100_v51 }
 0x123   :  { %v1703_v56 = vadd.f32 %v284_v55, %v282_v54  ;;  %v402_v55 = vunpack.c.h.bf16 %v1100_v51 }
 0x125   :  { %286 = vst [vmem:[%s2034_s2] sm:$0xff] %v1703_v56  ;;  %v293_v57 = vpack.c.bf16 %v1703_v56, %v1703_v56 }
 0x127   :  { %327 = vmatmul.mubr.bf16.vlgmr.msra.gmra.mrb[4].mxu0 %v293_v57  ;;  %1239 = vmatmul.mubr.bf16.vlgmr.msra.gmra.mrb[4].mxu1 %v293_v57 }
 0x128   :  { %406 = vmatpush1.bf16.msra.mxu0 %v1515_v3  ;;  %1243 = vmatpush3.bf16.msra.mxu1 %v1552_v9 }
 0x129   :  { %407 = vmatprep.subr.bf16.mxu0 %v1523_v4  ;;  %1244 = vmatprep.subr.bf16.mxu1 %v1486_v1 }
 0x12a   :  { %437 = vmatprep.mubr.bf16.mxu0 %v1487_v2  ;;  %1258 = vmatprep.mubr.msk.bf16.mxu1 %vm1488_vm0, %v1486_v1 }
 0x12c   :  { %408 = vmatpush1.bf16.msra.mxu0 %v1529_v5  ;;  %1245 = vmatpush3.bf16.msra.mxu1 %v1570_v12 }
 0x12d   :  { %409 = vmatprep.subr.bf16.mxu0 %v1535_v6  ;;  %1246 = vmatprep.subr.bf16.mxu1 %v1486_v1 }
 0x130   :  { %410 = vmatpush1.bf16.msra.mxu0 %v1541_v7  ;;  %1247 = vmatpush3.bf16.msra.mxu1 %v1589_v15 }
 0x131   :  { %411 = vmatprep.subr.bf16.mxu0 %v1547_v8  ;;  %1248 = vmatprep.subr.bf16.mxu1 %v1486_v1 }
 0x134   :  { %412 = vmatpush1.bf16.msra.mxu0 %v1558_v10  ;;  %1249 = vmatpush3.bf16.msra.mxu1 %v1608_v18 }
 0x135   :  { %413 = vmatprep.subr.bf16.mxu0 %v1563_v11  ;;  %1250 = vmatprep.subr.bf16.mxu1 %v1486_v1 }
 0x138   :  { %414 = vmatpush1.bf16.msra.mxu0 %v1576_v13  ;;  %1251 = vmatpush3.bf16.msra.mxu1 %v1627_v21 }
 0x139   :  { %415 = vmatprep.subr.bf16.mxu0 %v1582_v14  ;;  %1252 = vmatprep.subr.bf16.mxu1 %v1486_v1 }
 0x13c   :  { %416 = vmatpush1.bf16.msra.mxu0 %v1596_v16  ;;  %1253 = vmatpush3.bf16.msra.mxu1 %v1641_v23 }
 0x13d   :  { %417 = vmatprep.subr.bf16.mxu0 %v1602_v17  ;;  %1254 = vmatprep.subr.bf16.mxu1 %v1486_v1 }
 0x140   :  { %418 = vmatpush1.bf16.msra.mxu0 %v1615_v19  ;;  %1255 = vmatpush3.bf16.msra.mxu1 %v1649_v24 }
 0x141   :  { %419 = vmatprep.subr.bf16.mxu0 %v1621_v20  ;;  %1256 = vmatprep.subr.bf16.mxu1 %v1486_v1 }
 0x144   :  { %420 = vmatpush1.bf16.msra.mxu0 %v1634_v22  ;;  %1257 = vmatpush3.bf16.msra.mxu1 %v1659_v26 }
 0x145   :  { %516 = vmatprep.subr.bf16.mxu0 %v1508_v0  ;;  %1262 = vmatprep.subr.bf16.mxu1 %v1486_v1 }
 0x1fa   :  { %v328_v60 = vpop.f32.mrb[4].mxu0  ;;  %v369_v61 = vpop.f32.mrb[4].mxu1 }
 0x1fb   :  { %v375_v63 = vadd.f32 %v328_v60, %v290_v59  ;;  %v330_v25 = vpop.f32.mrb[5].mxu0  ;;  %v1240_v27 = vpop.f32.mrb[5].mxu1 }
 0x1fc   :  { %v332_v28 = vpop.f32.mrb[6].mxu0  ;;  %v372_v29 = vpop.f32.mrb[6].mxu1  ;;  %v382_v33 = vadd.f32 %v330_v25, %v291_v62 }
 0x1fd   :  { %v1097_v30 = vmul.f32 -1.442695, %v375_v63  ;;  %v333_v31 = vpop.f32.mrb[7].mxu0  ;;  %v1241_v32 = vpop.f32.mrb[7].mxu1 }
 0x1fe   :  { %v1098_v34 = vmul.f32 -1.442695, %v382_v33  ;;  %v403_v32 = vunpack.c.h.bf16 %v1752_v38 }
 0x1ff   :  { %1408 = vpow2.f32 %v1097_v30 }
 0x200   :  { %1410 = vpow2.f32 %v1098_v34 }
 0x209   :  { %v1409_v35 = vpop.eup %1408 }
 0x20a   :  { %v379_v36 = vadd.f32 1.0, %v1409_v35  ;;  %v1411_v37 = vpop.eup %1410 }
 0x20b   :  { %v386_v39 = vadd.f32 1.0, %v1411_v37 }
 0x20c   :  { %1412 = vrcp.f32 %v379_v36 }
 0x20d   :  { %1414 = vrcp.f32 %v386_v39 }
 0x216   :  { %v1413_v41 = vpop.eup %1412 }
 0x217   :  { %v389_v42 = vmul.f32 %v1413_v41, %v369_v61  ;;  %v1415_v44 = vpop.eup %1414 }
 0x218   :  { %v393_v45 = vsub.f32 1.0, %v1415_v44  ;;  %v392_v47 = vmul.f32 %v1415_v44, %v1703_v56 }
 0x219   :  { %v390_v43 = vadd.f32 %v389_v42, %v292_v40 }
 0x21b   :  { %1416 = vtanh.f32 %v390_v43  ;;  %v1105_v43 = vld [vmem:[%s2033_s0 + $0x24] sm:$0xff] }
 0x21c   :  { %v512_v44 = vunpack.c.l.bf16 %v1105_v43 }
 0x225   :  { %v1417_v46 = vpop.eup %1416 }
 0x226   :  { %v394_v48 = vmul.f32 %v1417_v46, %v393_v45 }
 0x228   :  { %v1756_v49 = vadd.f32 %v394_v48, %v392_v47  ;;  %v513_v47 = vunpack.c.h.bf16 %v1105_v43 }
 0x22a   :  { %1099 = vst [vmem:[%s2034_s2 + $0x8] sm:$0xff] %v1756_v49  ;;  %v404_v50 = vpack.c.bf16 %v1756_v49, %v1756_v49 }
 0x22c   :  { %438 = vmatmul.mubr.bf16.vlgmr.msra.gmra.mrb[8].mxu0 %v404_v50  ;;  %1259 = vmatmul.mubr.bf16.vlgmr.msra.gmra.mrb[8].mxu1 %v404_v50 }
 0x22d   :  { %517 = vmatpush1.bf16.msra.mxu0 %v1515_v3  ;;  %1263 = vmatpush3.bf16.msra.mxu1 %v1552_v9 }
 0x22e   :  { %518 = vmatprep.subr.bf16.mxu0 %v1523_v4  ;;  %1264 = vmatprep.subr.bf16.mxu1 %v1486_v1 }
 0x22f   :  { %548 = vmatprep.mubr.bf16.mxu0 %v1487_v2  ;;  %1278 = vmatprep.mubr.msk.bf16.mxu1 %vm1488_vm0, %v1486_v1 }
 0x231   :  { %519 = vmatpush1.bf16.msra.mxu0 %v1529_v5  ;;  %1265 = vmatpush3.bf16.msra.mxu1 %v1570_v12 }
 0x232   :  { %520 = vmatprep.subr.bf16.mxu0 %v1535_v6  ;;  %1266 = vmatprep.subr.bf16.mxu1 %v1486_v1 }
 0x235   :  { %521 = vmatpush1.bf16.msra.mxu0 %v1541_v7  ;;  %1267 = vmatpush3.bf16.msra.mxu1 %v1589_v15 }
 0x236   :  { %522 = vmatprep.subr.bf16.mxu0 %v1547_v8  ;;  %1268 = vmatprep.subr.bf16.mxu1 %v1486_v1 }
 0x239   :  { %523 = vmatpush1.bf16.msra.mxu0 %v1558_v10  ;;  %1269 = vmatpush3.bf16.msra.mxu1 %v1608_v18 }
 0x23a   :  { %524 = vmatprep.subr.bf16.mxu0 %v1563_v11  ;;  %1270 = vmatprep.subr.bf16.mxu1 %v1486_v1 }
 0x23d   :  { %525 = vmatpush1.bf16.msra.mxu0 %v1576_v13  ;;  %1271 = vmatpush3.bf16.msra.mxu1 %v1627_v21 }
 0x23e   :  { %526 = vmatprep.subr.bf16.mxu0 %v1582_v14  ;;  %1272 = vmatprep.subr.bf16.mxu1 %v1486_v1 }
 0x241   :  { %527 = vmatpush1.bf16.msra.mxu0 %v1596_v16  ;;  %1273 = vmatpush3.bf16.msra.mxu1 %v1641_v23 }
 0x242   :  { %528 = vmatprep.subr.bf16.mxu0 %v1602_v17  ;;  %1274 = vmatprep.subr.bf16.mxu1 %v1486_v1 }
 0x245   :  { %529 = vmatpush1.bf16.msra.mxu0 %v1615_v19  ;;  %1275 = vmatpush3.bf16.msra.mxu1 %v1649_v24 }
 0x246   :  { %530 = vmatprep.subr.bf16.mxu0 %v1621_v20  ;;  %1276 = vmatprep.subr.bf16.mxu1 %v1486_v1 }
 0x249   :  { %531 = vmatpush1.bf16.msra.mxu0 %v1634_v22  ;;  %1277 = vmatpush3.bf16.msra.mxu1 %v1659_v26 }
 0x24a   :  { %627 = vmatprep.subr.bf16.mxu0 %v1508_v0  ;;  %1282 = vmatprep.subr.bf16.mxu1 %v1486_v1 }
 0x2ff   :  { %v439_v53 = vpop.f32.mrb[8].mxu0  ;;  %v480_v54 = vpop.f32.mrb[8].mxu1 }
 0x300   :  { %v486_v56 = vadd.f32 %v439_v53, %v401_v52  ;;  %v441_v57 = vpop.f32.mrb[9].mxu0  ;;  %v1260_v58 = vpop.f32.mrb[9].mxu1 }
 0x301   :  { %v443_v59 = vpop.f32.mrb[10].mxu0  ;;  %v483_v60 = vpop.f32.mrb[10].mxu1  ;;  %v493_v25 = vadd.f32 %v441_v57, %v402_v55 }
 0x302   :  { %v1102_v61 = vmul.f32 -1.442695, %v486_v56  ;;  %v444_v62 = vpop.f32.mrb[11].mxu0  ;;  %v1261_v63 = vpop.f32.mrb[11].mxu1 }
 0x303   :  { %v1103_v27 = vmul.f32 -1.442695, %v493_v25 }
 0x304   :  { %1418 = vpow2.f32 %v1102_v61  ;;  %v1853_v61 = vld [vmem:[%s2033_s0 + $0x2c] ss:$12 sps:$4 sm:$0xff]  }
 0x305   :  { %1420 = vpow2.f32 %v1103_v27  ;;  %v514_v63 = vunpack.c.l.bf16 %v1853_v61 }
 0x30e   :  { %v1419_v28 = vpop.eup %1418 }
 0x30f   :  { %v490_v29 = vadd.f32 1.0, %v1419_v28  ;;  %v1421_v30 = vpop.eup %1420 }
 0x310   :  { %v497_v31 = vadd.f32 1.0, %v1421_v30 }
 0x311   :  { %1422 = vrcp.f32 %v490_v29 }
 0x312   :  { %1424 = vrcp.f32 %v497_v31 }
 0x31b   :  { %v1423_v33 = vpop.eup %1422 }
 0x31c   :  { %v500_v34 = vmul.f32 %v1423_v33, %v480_v54  ;;  %v1425_v36 = vpop.eup %1424 }
 0x31d   :  { %v504_v37 = vsub.f32 1.0, %v1425_v36  ;;  %v503_v40 = vmul.f32 %v1425_v36, %v1756_v49  ;;  %v1110_v36 = vld [vmem:[%s2033_s0 + $0x30] sm:$0xff] }
 0x31e   :  { %v501_v35 = vadd.f32 %v500_v34, %v403_v32 }
 0x320   :  { %1426 = vtanh.f32 %v501_v35 }
 0x32a   :  { %v1427_v39 = vpop.eup %1426 }
 0x32b   :  { %v505_v41 = vmul.f32 %v1427_v39, %v504_v37  ;;  %v623_v37 = vunpack.c.l.bf16 %v1110_v36 }
 0x32d   :  { %v1804_v42 = vadd.f32 %v505_v41, %v503_v40  ;;  %v624_v41 = vunpack.c.h.bf16 %v1110_v36 }
 0x32f   :  { %1104 = vst [vmem:[%s2034_s2 + $0x10] sm:$0xff] %v1804_v42  ;;  %v515_v38 = vpack.c.bf16 %v1804_v42, %v1804_v42 }
 0x331   :  { %549 = vmatmul.mubr.bf16.vlgmr.msra.gmra.mrb[12].mxu0 %v515_v38  ;;  %1279 = vmatmul.mubr.bf16.vlgmr.msra.gmra.mrb[12].mxu1 %v515_v38 }
 0x332   :  { %628 = vmatpush1.bf16.msra.mxu0 %v1515_v3  ;;  %1283 = vmatpush3.bf16.msra.mxu1 %v1552_v9 }
 0x333   :  { %629 = vmatprep.subr.bf16.mxu0 %v1523_v4  ;;  %1284 = vmatprep.subr.bf16.mxu1 %v1486_v1 }
 0x334   :  { %659 = vmatprep.mubr.bf16.mxu0 %v1487_v2  ;;  %1298 = vmatprep.mubr.msk.bf16.mxu1 %vm1488_vm0, %v1486_v1 }
 0x336   :  { %630 = vmatpush1.bf16.msra.mxu0 %v1529_v5  ;;  %1285 = vmatpush3.bf16.msra.mxu1 %v1570_v12 }
 0x337   :  { %631 = vmatprep.subr.bf16.mxu0 %v1535_v6  ;;  %1286 = vmatprep.subr.bf16.mxu1 %v1486_v1 }
 0x33a   :  { %632 = vmatpush1.bf16.msra.mxu0 %v1541_v7  ;;  %1287 = vmatpush3.bf16.msra.mxu1 %v1589_v15 }
 0x33b   :  { %633 = vmatprep.subr.bf16.mxu0 %v1547_v8  ;;  %1288 = vmatprep.subr.bf16.mxu1 %v1486_v1 }
 0x33e   :  { %634 = vmatpush1.bf16.msra.mxu0 %v1558_v10  ;;  %1289 = vmatpush3.bf16.msra.mxu1 %v1608_v18 }
 0x33f   :  { %635 = vmatprep.subr.bf16.mxu0 %v1563_v11  ;;  %1290 = vmatprep.subr.bf16.mxu1 %v1486_v1 }
 0x342   :  { %636 = vmatpush1.bf16.msra.mxu0 %v1576_v13  ;;  %1291 = vmatpush3.bf16.msra.mxu1 %v1627_v21 }
 0x343   :  { %637 = vmatprep.subr.bf16.mxu0 %v1582_v14  ;;  %1292 = vmatprep.subr.bf16.mxu1 %v1486_v1 }
 0x346   :  { %638 = vmatpush1.bf16.msra.mxu0 %v1596_v16  ;;  %1293 = vmatpush3.bf16.msra.mxu1 %v1641_v23 }
 0x347   :  { %639 = vmatprep.subr.bf16.mxu0 %v1602_v17  ;;  %1294 = vmatprep.subr.bf16.mxu1 %v1486_v1 }
 0x34a   :  { %640 = vmatpush1.bf16.msra.mxu0 %v1615_v19  ;;  %1295 = vmatpush3.bf16.msra.mxu1 %v1649_v24 }
 0x34b   :  { %641 = vmatprep.subr.bf16.mxu0 %v1621_v20  ;;  %1296 = vmatprep.subr.bf16.mxu1 %v1486_v1 }
 0x34e   :  { %642 = vmatpush1.bf16.msra.mxu0 %v1634_v22  ;;  %1297 = vmatpush3.bf16.msra.mxu1 %v1659_v26 }
 0x34f   :  { %738 = vmatprep.subr.bf16.mxu0 %v1508_v0  ;;  %1302 = vmatprep.subr.bf16.mxu1 %v1486_v1 }
 0x404   :  { %v550_v45 = vpop.f32.mrb[12].mxu0  ;;  %v591_v46 = vpop.f32.mrb[12].mxu1 }
 0x405   :  { %v597_v48 = vadd.f32 %v550_v45, %v512_v44  ;;  %v552_v49 = vpop.f32.mrb[13].mxu0  ;;  %v1280_v50 = vpop.f32.mrb[13].mxu1 }
 0x406   :  { %v554_v51 = vpop.f32.mrb[14].mxu0  ;;  %v594_v52 = vpop.f32.mrb[14].mxu1  ;;  %v604_v56 = vadd.f32 %v552_v49, %v513_v47 }
 0x407   :  { %v1107_v53 = vmul.f32 -1.442695, %v597_v48  ;;  %v555_v54 = vpop.f32.mrb[15].mxu0  ;;  %v1281_v55 = vpop.f32.mrb[15].mxu1 }
 0x408   :  { %v1108_v57 = vmul.f32 -1.442695, %v604_v56  ;;  %v625_v55 = vunpack.c.h.bf16 %v1853_v61 }
 0x409   :  { %1428 = vpow2.f32 %v1107_v53 }
 0x40a   :  { %1430 = vpow2.f32 %v1108_v57 }
 0x413   :  { %v1429_v58 = vpop.eup %1428 }
 0x414   :  { %v601_v59 = vadd.f32 1.0, %v1429_v58  ;;  %v1431_v60 = vpop.eup %1430 }
 0x415   :  { %v608_v62 = vadd.f32 1.0, %v1431_v60 }
 0x416   :  { %1432 = vrcp.f32 %v601_v59 }
 0x417   :  { %1434 = vrcp.f32 %v608_v62 }
 0x420   :  { %v1433_v25 = vpop.eup %1432 }
 0x421   :  { %v611_v27 = vmul.f32 %v1433_v25, %v591_v46  ;;  %v1435_v29 = vpop.eup %1434 }
 0x422   :  { %v615_v30 = vsub.f32 1.0, %v1435_v29  ;;  %v614_v32 = vmul.f32 %v1435_v29, %v1804_v42 }
 0x423   :  { %v612_v28 = vadd.f32 %v611_v27, %v514_v63 }
 0x425   :  { %1436 = vtanh.f32 %v612_v28 }
 0x42f   :  { %v1437_v31 = vpop.eup %1436 }
 0x430   :  { %v616_v33 = vmul.f32 %v1437_v31, %v615_v30 }
 0x432   :  { %v1857_v34 = vadd.f32 %v616_v33, %v614_v32 }
 0x434   :  { %1109 = vst [vmem:[%s2034_s2 + $0x18] sm:$0xff] %v1857_v34  ;;  %v626_v35 = vpack.c.bf16 %v1857_v34, %v1857_v34 }
 0x436   :  { %660 = vmatmul.mubr.bf16.vlgmr.msra.gmra.mrb[16].mxu0 %v626_v35  ;;  %1299 = vmatmul.mubr.bf16.vlgmr.msra.gmra.mrb[16].mxu1 %v626_v35 }
 0x437   :  { %739 = vmatpush1.bf16.msra.mxu0 %v1515_v3  ;;  %1303 = vmatpush3.bf16.msra.mxu1 %v1552_v9 }
 0x438   :  { %740 = vmatprep.subr.bf16.mxu0 %v1523_v4  ;;  %1304 = vmatprep.subr.bf16.mxu1 %v1486_v1 }
 0x439   :  { %770 = vmatprep.mubr.bf16.mxu0 %v1487_v2  ;;  %1318 = vmatprep.mubr.msk.bf16.mxu1 %vm1488_vm0, %v1486_v1 }
 0x43b   :  { %741 = vmatpush1.bf16.msra.mxu0 %v1529_v5  ;;  %1305 = vmatpush3.bf16.msra.mxu1 %v1570_v12 }
 0x43c   :  { %742 = vmatprep.subr.bf16.mxu0 %v1535_v6  ;;  %1306 = vmatprep.subr.bf16.mxu1 %v1486_v1 }
 0x43f   :  { %743 = vmatpush1.bf16.msra.mxu0 %v1541_v7  ;;  %1307 = vmatpush3.bf16.msra.mxu1 %v1589_v15 }
 0x440   :  { %744 = vmatprep.subr.bf16.mxu0 %v1547_v8  ;;  %1308 = vmatprep.subr.bf16.mxu1 %v1486_v1 }
 0x443   :  { %745 = vmatpush1.bf16.msra.mxu0 %v1558_v10  ;;  %1309 = vmatpush3.bf16.msra.mxu1 %v1608_v18 }
 0x444   :  { %746 = vmatprep.subr.bf16.mxu0 %v1563_v11  ;;  %1310 = vmatprep.subr.bf16.mxu1 %v1486_v1 }
 0x447   :  { %747 = vmatpush1.bf16.msra.mxu0 %v1576_v13  ;;  %1311 = vmatpush3.bf16.msra.mxu1 %v1627_v21 }
 0x448   :  { %748 = vmatprep.subr.bf16.mxu0 %v1582_v14  ;;  %1312 = vmatprep.subr.bf16.mxu1 %v1486_v1 }
 0x44b   :  { %749 = vmatpush1.bf16.msra.mxu0 %v1596_v16  ;;  %1313 = vmatpush3.bf16.msra.mxu1 %v1641_v23 }
 0x44c   :  { %750 = vmatprep.subr.bf16.mxu0 %v1602_v17  ;;  %1314 = vmatprep.subr.bf16.mxu1 %v1486_v1 }
 0x44f   :  { %751 = vmatpush1.bf16.msra.mxu0 %v1615_v19  ;;  %1315 = vmatpush3.bf16.msra.mxu1 %v1649_v24 }
 0x450   :  { %752 = vmatprep.subr.bf16.mxu0 %v1621_v20  ;;  %1316 = vmatprep.subr.bf16.mxu1 %v1486_v1 }
 0x453   :  { %753 = vmatpush1.bf16.msra.mxu0 %v1634_v22  ;;  %1317 = vmatpush3.bf16.msra.mxu1 %v1659_v26 }
 0x454   :  { %849 = vmatprep.subr.bf16.mxu0 %v1508_v0  ;;  %1322 = vmatprep.subr.bf16.mxu1 %v1486_v1 }
 0x509   :  { %v661_v39 = vpop.f32.mrb[16].mxu0  ;;  %v702_v40 = vpop.f32.mrb[16].mxu1 }
 0x50a   :  { %v708_v42 = vadd.f32 %v661_v39, %v623_v37  ;;  %v663_v38 = vpop.f32.mrb[17].mxu0  ;;  %v1300_v43 = vpop.f32.mrb[17].mxu1  ;;  %v1954_v37 = vld [vmem:[%s2033_s0 + $0x44] ss:$12 sps:$4 sm:$0xff]  }
 0x50b   :  { %v665_v44 = vpop.f32.mrb[18].mxu0  ;;  %v705_v45 = vpop.f32.mrb[18].mxu1  ;;  %v715_v49 = vadd.f32 %v663_v38, %v624_v41 }
 0x50c   :  { %v1112_v46 = vmul.f32 -1.442695, %v708_v42  ;;  %v666_v47 = vpop.f32.mrb[19].mxu0  ;;  %v1301_v48 = vpop.f32.mrb[19].mxu1 }
 0x50d   :  { %v1113_v50 = vmul.f32 -1.442695, %v715_v49 }
 0x50e   :  { %1438 = vpow2.f32 %v1112_v46 }
 0x50f   :  { %1440 = vpow2.f32 %v1113_v50  ;;  %v1478_v50 = vld [vmem:[%s2032_s1] ss:$12 sps:$4 sm:$0xff]  }
 0x518   :  { %v1439_v51 = vpop.eup %1438 }
 0x519   :  { %v712_v52 = vadd.f32 1.0, %v1439_v51  ;;  %v1441_v53 = vpop.eup %1440  ;;  %v1479_v51 = vld [vmem:[%s2032_s1 + $0x1c] ss:$12 sps:$4 sm:$0xff]  }
 0x51a   :  { %v719_v54 = vadd.f32 1.0, %v1441_v53  ;;  %v1483_v53 = vld [vmem:[%s2032_s1 + $0x4c] ss:$12 sps:$4 sm:$0xff]  }
 0x51b   :  { %1442 = vrcp.f32 %v712_v52  ;;  %v1480_v52 = vld [vmem:[%s2032_s1 + $0x18] ss:$12 sps:$4 sm:$0xff]  }
 0x51c   :  { %1444 = vrcp.f32 %v719_v54  ;;  %v1485_v54 = vld [vmem:[%s2032_s1 + $0x64] ss:$12 sps:$4 sm:$0xff]  }
 0x525   :  { %v1443_v56 = vpop.eup %1442 }
 0x526   :  { %v722_v57 = vmul.f32 %v1443_v56, %v702_v40  ;;  %v1445_v59 = vpop.eup %1444  ;;  %v736_v40 = vunpack.c.l.bf16 %v1954_v37 }
 0x527   :  { %v726_v60 = vsub.f32 1.0, %v1445_v59  ;;  %v725_v63 = vmul.f32 %v1445_v59, %v1857_v34 }
 0x528   :  { %v723_v58 = vadd.f32 %v722_v57, %v625_v55 }
 0x52a   :  { %1446 = vtanh.f32 %v723_v58 }
 0x534   :  { %v1447_v62 = vpop.eup %1446 }
 0x535   :  { %v727_v25 = vmul.f32 %v1447_v62, %v726_v60  ;;  %v847_v60 = vunpack.c.h.bf16 %v1954_v37 }
 0x537   :  { %v1905_v27 = vadd.f32 %v727_v25, %v725_v63 }
 0x539   :  { %1114 = vst [vmem:[%s2034_s2 + $0x20] sm:$0xff] %v1905_v27  ;;  %v737_v61 = vpack.c.bf16 %v1905_v27, %v1905_v27 }
 0x53b   :  { %771 = vmatmul.mubr.bf16.vlgmr.msra.gmra.mrb[20].mxu0 %v737_v61  ;;  %1319 = vmatmul.mubr.bf16.vlgmr.msra.gmra.mrb[20].mxu1 %v737_v61 }
 0x53c   :  { %850 = vmatpush1.bf16.msra.mxu0 %v1515_v3  ;;  %1323 = vmatpush3.bf16.msra.mxu1 %v1552_v9  ;;  %v1115_v3 = vld [vmem:[%s2033_s0 + $0x3c] sm:$0xff] }
 0x53d   :  { %851 = vmatprep.subr.bf16.mxu0 %v1523_v4  ;;  %1324 = vmatprep.subr.bf16.mxu1 %v1486_v1  ;;  %v734_v4 = vunpack.c.l.bf16 %v1115_v3 }
 0x53e   :  { %881 = vmatprep.mubr.bf16.mxu0 %v1487_v2  ;;  %1338 = vmatprep.mubr.msk.bf16.mxu1 %vm1488_vm0, %v1486_v1 }
 0x540   :  { %852 = vmatpush1.bf16.msra.mxu0 %v1529_v5  ;;  %1325 = vmatpush3.bf16.msra.mxu1 %v1570_v12 }
 0x541   :  { %853 = vmatprep.subr.bf16.mxu0 %v1535_v6  ;;  %1326 = vmatprep.subr.bf16.mxu1 %v1486_v1 }
 0x544   :  { %854 = vmatpush1.bf16.msra.mxu0 %v1541_v7  ;;  %1327 = vmatpush3.bf16.msra.mxu1 %v1589_v15  ;;  %v735_v7 = vunpack.c.h.bf16 %v1115_v3 }
 0x545   :  { %855 = vmatprep.subr.bf16.mxu0 %v1547_v8  ;;  %1328 = vmatprep.subr.bf16.mxu1 %v1486_v1 }
 0x548   :  { %856 = vmatpush1.bf16.msra.mxu0 %v1558_v10  ;;  %1329 = vmatpush3.bf16.msra.mxu1 %v1608_v18 }
 0x549   :  { %857 = vmatprep.subr.bf16.mxu0 %v1563_v11  ;;  %1330 = vmatprep.subr.bf16.mxu1 %v1486_v1 }
 0x54c   :  { %858 = vmatpush1.bf16.msra.mxu0 %v1576_v13  ;;  %1331 = vmatpush3.bf16.msra.mxu1 %v1627_v21 }
 0x54d   :  { %859 = vmatprep.subr.bf16.mxu0 %v1582_v14  ;;  %1332 = vmatprep.subr.bf16.mxu1 %v1486_v1 }
 0x550   :  { %860 = vmatpush1.bf16.msra.mxu0 %v1596_v16  ;;  %1333 = vmatpush3.bf16.msra.mxu1 %v1641_v23 }
 0x551   :  { %861 = vmatprep.subr.bf16.mxu0 %v1602_v17  ;;  %1334 = vmatprep.subr.bf16.mxu1 %v1486_v1 }
 0x554   :  { %862 = vmatpush1.bf16.msra.mxu0 %v1615_v19  ;;  %1335 = vmatpush3.bf16.msra.mxu1 %v1649_v24 }
 0x555   :  { %863 = vmatprep.subr.bf16.mxu0 %v1621_v20  ;;  %1336 = vmatprep.subr.bf16.mxu1 %v1486_v1 }
 0x558   :  { %864 = vmatpush1.bf16.msra.mxu0 %v1634_v22  ;;  %1337 = vmatpush3.bf16.msra.mxu1 %v1659_v26 }
 0x559   :  { %960 = vmatprep.subr.bf16.mxu0 %v1508_v0  ;;  %1342 = vmatprep.subr.bf16.mxu1 %v1486_v1 }
 0x60e   :  { %v772_v5 = vpop.f32.mrb[20].mxu0  ;;  %v813_v6 = vpop.f32.mrb[20].mxu1 }
 0x60f   :  { %v819_v8 = vadd.f32 %v772_v5, %v734_v4  ;;  %v774_v10 = vpop.f32.mrb[21].mxu0  ;;  %v1320_v11 = vpop.f32.mrb[21].mxu1 }
 0x610   :  { %v776_v28 = vpop.f32.mrb[22].mxu0  ;;  %v816_v29 = vpop.f32.mrb[22].mxu1  ;;  %v826_v33 = vadd.f32 %v774_v10, %v735_v7 }
 0x611   :  { %v1117_v30 = vmul.f32 -1.442695, %v819_v8  ;;  %v777_v31 = vpop.f32.mrb[23].mxu0  ;;  %v1321_v32 = vpop.f32.mrb[23].mxu1  ;;  %v1125_v8 = vld [vmem:[%s2033_s0 + $0x54] sm:$0xff] }
 0x612   :  { %v1118_v0 = vmul.f32 -1.442695, %v826_v33  ;;  %v956_v10 = vunpack.c.l.bf16 %v1125_v8  ;;  %v957_v29 = vunpack.c.h.bf16 %v1125_v8 }
 0x613   :  { %1448 = vpow2.f32 %v1117_v30 }
 0x614   :  { %1450 = vpow2.f32 %v1118_v0 }
 0x61d   :  { %v1449_v34 = vpop.eup %1448 }
 0x61e   :  { %v823_v35 = vadd.f32 1.0, %v1449_v34  ;;  %v1451_v36 = vpop.eup %1450 }
 0x61f   :  { %v830_v39 = vadd.f32 1.0, %v1451_v36 }
 0x620   :  { %1452 = vrcp.f32 %v823_v35 }
 0x621   :  { %1454 = vrcp.f32 %v830_v39 }
 0x62a   :  { %v1453_v41 = vpop.eup %1452 }
 0x62b   :  { %v833_v42 = vmul.f32 %v1453_v41, %v813_v6  ;;  %v1455_v43 = vpop.eup %1454 }
 0x62c   :  { %v837_v44 = vsub.f32 1.0, %v1455_v43  ;;  %v836_v46 = vmul.f32 %v1455_v43, %v1905_v27 }
 0x62d   :  { %v834_v38 = vadd.f32 %v833_v42, %v736_v40 }
 0x62f   :  { %1456 = vtanh.f32 %v834_v38  ;;  %v1126_v38 = vld [vmem:[%s2033_s0 + $0x5c] sm:$0xf] }
 0x639   :  { %v1457_v45 = vpop.eup %1456 }
 0x63a   :  { %v838_v47 = vmul.f32 %v1457_v45, %v837_v44  ;;  %v958_v44 = vunpack.c.l.bf16 %v1126_v38 }
 0x63c   :  { %v1958_v48 = vadd.f32 %v838_v47, %v836_v46 }
 0x63e   :  { %1119 = vst [vmem:[%s2034_s2 + $0x28] sm:$0xff] %v1958_v48  ;;  %v848_v49 = vpack.c.bf16 %v1958_v48, %v1958_v48 }
 0x640   :  { %882 = vmatmul.mubr.bf16.vlgmr.msra.gmra.mrb[24].mxu0 %v848_v49  ;;  %1339 = vmatmul.mubr.bf16.vlgmr.msra.gmra.mrb[24].mxu1 %v848_v49 }
 0x641   :  { %961 = vmatpush1.bf16.msra.mxu0 %v1478_v50  ;;  %1343 = vmatpush3.bf16.msra.mxu1 %v1552_v9  ;;  %v1481_v9 = vld [vmem:[%s2032_s1 + $0x34] ss:$12 sps:$4 sm:$0xff]  }
 0x642   :  { %962 = vmatprep.subr.bf16.mxu0 %v1479_v51  ;;  %1344 = vmatprep.subr.bf16.mxu1 %v1486_v1 }
 0x643   :  { %992 = vmatprep.mubr.bf16.mxu0 %v1487_v2  ;;  %1358 = vmatprep.mubr.msk.bf16.mxu1 %vm1488_vm0, %v1486_v1  ;;  %v1482_v2 = vld [vmem:[%s2032_s1 + $0x30] ss:$12 sps:$4 sm:$0xff]  }
 0x645   :  { %963 = vmatpush1.bf16.msra.mxu0 %v1480_v52  ;;  %1345 = vmatpush3.bf16.msra.mxu1 %v1570_v12  ;;  %v1484_v12 = vld [vmem:[%s2032_s1 + $0x48] ss:$12 sps:$4 sm:$0xff]  }
 0x646   :  { %964 = vmatprep.subr.bf16.mxu0 %v1481_v9  ;;  %1346 = vmatprep.subr.bf16.mxu1 %v1486_v1 }
 0x649   :  { %965 = vmatpush1.bf16.msra.mxu0 %v1482_v2  ;;  %1347 = vmatpush3.bf16.msra.mxu1 %v1589_v15 }
 0x64a   :  { %966 = vmatprep.subr.bf16.mxu0 %v1483_v53  ;;  %1348 = vmatprep.subr.bf16.mxu1 %v1486_v1 }
 0x64d   :  { %967 = vmatpush1.bf16.msra.mxu0 %v1484_v12  ;;  %1349 = vmatpush3.bf16.msra.mxu1 %v1608_v18 }
 0x64e   :  { %968 = vmatprep.subr.bf16.mxu0 %v1485_v54  ;;  %1350 = vmatprep.subr.bf16.mxu1 %v1486_v1 }
 0x651   :  { %969 = vmatpush1.bf16.msra.mxu0 %v1576_v13  ;;  %1351 = vmatpush3.bf16.msra.mxu1 %v1627_v21  ;;  %v1120_v13 = vld [vmem:[%s2033_s0 + $0x48] sm:$0xff] }
 0x652   :  { %970 = vmatprep.subr.bf16.mxu0 %v1582_v14  ;;  %1352 = vmatprep.subr.bf16.mxu1 %v1486_v1  ;;  %v845_v14 = vunpack.c.l.bf16 %v1120_v13 }
 0x655   :  { %971 = vmatpush1.bf16.msra.mxu0 %v1596_v16  ;;  %1353 = vmatpush3.bf16.msra.mxu1 %v1641_v23 }
 0x656   :  { %972 = vmatprep.subr.bf16.mxu0 %v1602_v17  ;;  %1354 = vmatprep.subr.bf16.mxu1 %v1486_v1  ;;  %v846_v17 = vunpack.c.h.bf16 %v1120_v13 }
 0x659   :  { %973 = vmatpush1.bf16.msra.mxu0 %v1615_v19  ;;  %1355 = vmatpush3.bf16.msra.mxu1 %v1649_v24 }
 0x65a   :  { %974 = vmatprep.subr.bf16.mxu0 %v1621_v20  ;;  %1356 = vmatprep.subr.bf16.mxu1 %v1486_v1 }
 0x65d   :  { %975 = vmatpush1.bf16.msra.mxu0 %v1634_v22  ;;  %1357 = vmatpush3.bf16.msra.mxu1 %v1659_v26 }
 0x713   :  { %v883_v15 = vpop.f32.mrb[24].mxu0  ;;  %v924_v16 = vpop.f32.mrb[24].mxu1 }
 0x714   :  { %v930_v18 = vadd.f32 %v883_v15, %v845_v14  ;;  %v885_v19 = vpop.f32.mrb[25].mxu0  ;;  %v1340_v21 = vpop.f32.mrb[25].mxu1 }
 0x715   :  { %v887_v23 = vpop.f32.mrb[26].mxu0  ;;  %v927_v24 = vpop.f32.mrb[26].mxu1  ;;  %v937_v56 = vadd.f32 %v885_v19, %v846_v17 }
 0x716   :  { %v1122_v20 = vmul.f32 -1.442695, %v930_v18  ;;  %v888_v55 = vpop.f32.mrb[27].mxu0  ;;  %v1341_v1 = vpop.f32.mrb[27].mxu1 }
 0x717   :  { %v1123_v22 = vmul.f32 -1.442695, %v937_v56 }
 0x718   :  { %1458 = vpow2.f32 %v1122_v20 }
 0x719   :  { %1460 = vpow2.f32 %v1123_v22 }
 0x722   :  { %v1459_v26 = vpop.eup %1458 }
 0x723   :  { %v934_v57 = vadd.f32 1.0, %v1459_v26  ;;  %v1461_v58 = vpop.eup %1460 }
 0x724   :  { %v941_v59 = vadd.f32 1.0, %v1461_v58 }
 0x725   :  { %1462 = vrcp.f32 %v934_v57 }
 0x726   :  { %1464 = vrcp.f32 %v941_v59 }
 0x72f   :  { %v1463_v62 = vpop.eup %1462 }
 0x730   :  { %v944_v63 = vmul.f32 %v1463_v62, %v924_v16  ;;  %v1465_v27 = vpop.eup %1464 }
 0x731   :  { %v948_v61 = vsub.f32 1.0, %v1465_v27  ;;  %v947_v4 = vmul.f32 %v1465_v27, %v1958_v48 }
 0x732   :  { %v945_v25 = vadd.f32 %v944_v63, %v847_v60 }
 0x734   :  { %1466 = vtanh.f32 %v945_v25 }
 0x73e   :  { %v1467_v3 = vpop.eup %1466 }
 0x73f   :  { %v949_v5 = vmul.f32 %v1467_v3, %v948_v61 }
 0x741   :  { %v950_v6 = vadd.f32 %v949_v5, %v947_v4 }
 0x743   :  { %1124 = vst [vmem:[%s2034_s2 + $0x30] sm:$0xff] %v950_v6  ;;  %v959_v7 = vpack.c.bf16 %v950_v6, %v950_v6 }
 0x745   :  { %993 = vmatmul.mubr.bf16.vlgmr.msra.gmra.mrb[28].mxu0 %v959_v7  ;;  %1359 = vmatmul.mubr.bf16.vlgmr.msra.gmra.mrb[28].mxu1 %v959_v7 }
 0x818   :  { %v994_v11 = vpop.f32.mrb[28].mxu0  ;;  %v1035_v28 = vpop.f32.mrb[28].mxu1 }
 0x819   :  { %v1041_v30 = vadd.f32 %v994_v11, %v956_v10  ;;  %v996_v31 = vpop.f32.mrb[29].mxu0  ;;  %v1360_v32 = vpop.f32.mrb[29].mxu1 }
 0x81a   :  { %v998_v33 = vpop.f32.mrb[30].mxu0  ;;  %v1038_v0 = vpop.f32.mrb[30].mxu1  ;;  %v1048_v37 = vadd.f32 %v996_v31, %v957_v29 }
 0x81b   :  { %v1127_v34 = vmul.f32 -1.442695, %v1041_v30  ;;  %v999_v35 = vpop.f32.mrb[31].mxu0  ;;  %v1361_v36 = vpop.f32.mrb[31].mxu1 }
 0x81c   :  { %v1128_v39 = vmul.f32 -1.442695, %v1048_v37 }
 0x81d   :  { %1468 = vpow2.f32 %v1127_v34 }
 0x81e   :  { %1470 = vpow2.f32 %v1128_v39 }
 0x827   :  { %v1469_v40 = vpop.eup %1468 }
 0x828   :  { %v1045_v41 = vadd.f32 1.0, %v1469_v40  ;;  %v1471_v42 = vpop.eup %1470 }
 0x829   :  { %v1052_v43 = vadd.f32 1.0, %v1471_v42 }
 0x82a   :  { %1472 = vrcp.f32 %v1045_v41 }
 0x82b   :  { %1474 = vrcp.f32 %v1052_v43 }
 0x834   :  { %v1473_v45 = vpop.eup %1472 }
 0x835   :  { %v1055_v46 = vmul.f32 %v1473_v45, %v1035_v28  ;;  %v1475_v48 = vpop.eup %1474 }
 0x836   :  { %v1059_v49 = vsub.f32 1.0, %v1475_v48  ;;  %v1058_v51 = vmul.f32 %v1475_v48, %v950_v6 }
 0x837   :  { %v1056_v47 = vadd.f32 %v1055_v46, %v958_v44 }
 0x839   :  { %1476 = vtanh.f32 %v1056_v47 }
 0x843   :  { %v1477_v50 = vpop.eup %1476 }
 0x844   :  { %v1060_v52 = vmul.f32 %v1477_v50, %v1059_v49 }
 0x846   :  { %v1061_v9 = vadd.f32 %v1060_v52, %v1058_v51 }
 0x848   :  { %1129 = vst [vmem:[%s2034_s2 + $0x38] sm:$0xff] %v1061_v9 }

</bundles_post_ra>
